<compile_context>
chip_gen: v7x
topology: tpu7x:2x2x1
jax: 0.10.0
libtpu: 0.0.40
codegen_flags: <defaults>
</compile_context>

<pallas_src>
import functools
import math

import jax
import jax.numpy as jnp
import numpy as np
from jax.experimental import pallas as pl
from jax.experimental.pallas import tpu as pltpu

LN_EPS = 1e-5


def _round_up(x, m):
    return ((x + m - 1) // m) * m


def _tpu_vmem_capacity_bytes():
    try:
        cap = int(pltpu.get_tpu_info().vmem_capacity_bytes)
        if cap > 0:
            return cap
    except Exception:
        pass
    return 128 * 1024 * 1024          # v5e / v6e default


_VMEM_CAP = _tpu_vmem_capacity_bytes()
# Leave headroom for compiler-internal scratch; never declare the full physical VMEM.
_VMEM_LIMIT = min(_VMEM_CAP - 8 * 1024 * 1024, 112 * 1024 * 1024)
# Smaller row tile on 64 MiB-VMEM parts (v7x); 256 rows feeds v5e/v6e MXUs well.
_TARGET_ROWS = 128 if _VMEM_CAP <= 64 * 1024 * 1024 else 256

# Constant-index weight blocks are fetched once, so single-buffering them halves
# resident weight VMEM.  If this Pallas build rejects buffer_count=1 we fall back to
# default pipelining rather than failing the whole layer.
_SINGLE_BUFFER_WEIGHTS = True


def _layernorm(x, gamma, beta, inv_n):
    # Padded feature lanes of `x` are exactly zero, so plain sums over the padded
    # axis give correct statistics when divided by the *real* feature count.
    mu = jnp.sum(x, axis=-1, keepdims=True) * inv_n
    var = jnp.maximum(jnp.sum(x * x, axis=-1, keepdims=True) * inv_n - mu * mu, 0.0)
    # gamma/beta are zero on padded lanes -> padded lanes of the output stay zero.
    return (x - mu) * jax.lax.rsqrt(var + LN_EPS) * gamma + beta


# --------------------------------------------------------------------------------------
# Kernel A: q/k/v projections + single-head attention + out-proj + residual + LayerNorm
# --------------------------------------------------------------------------------------
def _attn_kernel(q_ref, k_ref, v_ref,
                 wq_ref, wk_ref, wv_ref, wo_ref,
                 vec_ref, kb_ref, o_ref,
                 *, scaling, inv_e, mask_keys):
    bt, lq, ep = q_ref.shape
    _, lk, kdp = k_ref.shape
    vdp = v_ref.shape[-1]

    x = q_ref[...]                                    # (bt, lq, ep) f32 residual stream
    x2 = x.reshape(bt * lq, ep)                       # fold rows -> bigger MXU M dim
    xb = x2.astype(jnp.bfloat16)

    vecs = vec_ref[...]                               # (8, ep) packed bias/LN params
    bq, bk, bv, bo = vecs[0:1], vecs[1:2], vecs[2:3], vecs[3:4]
    gn, bn = vecs[4:5], vecs[5:6]

    # --- in-projections: weights pre-transposed to (in, out), bf16, f32 accumulate ---
    q = jnp.dot(xb, wq_ref[...], preferred_element_type=jnp.float32) + bq
    k = jnp.dot(k_ref[...].reshape(bt * lk, kdp), wk_ref[...],
                preferred_element_type=jnp.float32) + bk
    v = jnp.dot(v_ref[...].reshape(bt * lk, vdp), wv_ref[...],
                preferred_element_type=jnp.float32) + bv

    q = (q * scaling).reshape(bt, lq, ep)             # nhead=1 -> scale by real E^-0.5
    k = k.reshape(bt, lk, ep)
    v = v.reshape(bt, lk, ep)

    # --- scaled dot-product attention (single head): bf16 MXU, f32 softmax ---
    s = jnp.einsum("bqe,bke->bqk", q.astype(jnp.bfloat16), k.astype(jnp.bfloat16),
                   preferred_element_type=jnp.float32)
    if mask_keys:
        # Precomputed additive bias: 0 on real keys, -1e30 on zero-padded key rows
        # (which still carry the k-projection bias).
        s = s + kb_ref[...]
    s = s - jnp.max(s, axis=-1, keepdims=True)
    p = jnp.exp(s)
    p = p * pl.reciprocal(jnp.sum(p, axis=-1, keepdims=True), approx=True)
    attn = jnp.einsum("bqk,bke->bqe", p.astype(jnp.bfloat16), v.astype(jnp.bfloat16),
                      preferred_element_type=jnp.float32)

    # --- out-projection + residual + LayerNorm (self.norm) ---
    attn = jnp.dot(attn.reshape(bt * lq, ep).astype(jnp.bfloat16), wo_ref[...],
                   preferred_element_type=jnp.float32) + bo
    src = x2 + attn
    src = _layernorm(src, gn, bn, inv_e)
    o_ref[...] = src.reshape(bt, lq, ep)


# --------------------------------------------------------------------------------------
# Kernel B: linear2(gelu(linear1(src))) + residual + LayerNorm (self.norm2)
# --------------------------------------------------------------------------------------
def _ffn_kernel(x_ref, w1_ref, w2_ref, vec_ref, o_ref, *, inv_e):
    bt, lq, ep = x_ref.shape
    x2 = x_ref[...].reshape(bt * lq, ep)

    vecs = vec_ref[...]
    b1, b2, gn2, bn2 = vecs[0:1], vecs[1:2], vecs[2:3], vecs[3:4]

    h = jnp.dot(x2.astype(jnp.bfloat16), w1_ref[...],
                preferred_element_type=jnp.float32) + b1
    h = jax.nn.gelu(h, approximate=False)             # exact (erf) gelu == F.gelu default
    ff = jnp.dot(h.astype(jnp.bfloat16), w2_ref[...],
                 preferred_element_type=jnp.float32) + b2
    src = x2 + ff
    src = _layernorm(src, gn2, bn2, inv_e)
    o_ref[...] = src.reshape(bt, lq, ep)


# --------------------------------------------------------------------------------------
# Wrapper
# --------------------------------------------------------------------------------------
def _choose_batch_tile(batch, lq_pad, target_rows):
    # Fold batch elements so bt * Lqp rows approach the MXU width.  No forced >=2 grid
    # steps: single-TC chips (v5e/v6e) gain nothing from splitting, and on multi-TC
    # parts the batch axis is marked "parallel" so any grid > 1 still shards.
    return max(1, min(batch, target_rows // max(lq_pad, 1)))


def prepare_params(params, E, Kd, Vd):
    """One-time parameter prep (pad + transpose + bf16 cast), hoisted out of forward."""
    (wq, bq, wk, bk, wv, bv, wo, bo, w1, b1, w2, b2, gn, bn, gn2, bn2) = params
    Ep, Kdp, Vdp = _round_up(E, 128), _round_up(Kd, 128), _round_up(Vd, 128)

    def prep_w(w, in_p, out_p):   # torch (out, in) layout -> padded (in, out) bf16
        w = jnp.asarray(w, jnp.float32)
        wt = jnp.pad(w.T, ((0, in_p - w.shape[1]), (0, out_p - w.shape[0])))
        return wt.astype(jnp.bfloat16)

    def prep_v(v):                # (E,) or (1, E) -> padded (Ep,) f32
        v = jnp.asarray(v, jnp.float32).reshape(-1)
        return jnp.pad(v, (0, Ep - v.shape[0]))

    zeros = jnp.zeros((Ep,), jnp.float32)
    attn_vecs = jnp.stack([prep_v(bq), prep_v(bk), prep_v(bv), prep_v(bo),
                           prep_v(gn), prep_v(bn), zeros, zeros])          # (8, Ep)
    ffn_vecs = jnp.stack([prep_v(b1), prep_v(b2), prep_v(gn2), prep_v(bn2),
                          zeros, zeros, zeros, zeros])                     # (8, Ep)

    return dict(
        wq=prep_w(wq, Ep, Ep), wk=prep_w(wk, Kdp, Ep), wv=prep_w(wv, Vdp, Ep),
        wo=prep_w(wo, Ep, Ep), w1=prep_w(w1, Ep, Ep), w2=prep_w(w2, Ep, Ep),
        attn_vecs=attn_vecs, ffn_vecs=ffn_vecs,
        E=E, Kd=Kd, Vd=Vd, Ep=Ep, Kdp=Kdp, Vdp=Vdp,
    )


def _forward(src_q, src_k, src_v, prepared, single_buffer):
    B, Lq, E = src_q.shape
    _, Lk, Kd = src_k.shape
    Vd = src_v.shape[-1]
    assert (E, Kd, Vd) == (prepared["E"], prepared["Kd"], prepared["Vd"])
    Ep, Kdp, Vdp = prepared["Ep"], prepared["Kdp"], prepared["Vdp"]

    Lqp = _round_up(Lq, 8)
    Lkp = _round_up(Lk, 128)     # lane-dense score matrix; padded keys masked via kbias

    bt = _choose_batch_tile(B, Lqp, _TARGET_ROWS)
    Bp = _round_up(B, bt)
    grid = (Bp // bt,)

    def pad3(a, b_, l_, d_, dtype):
        a = jnp.asarray(a, jnp.float32)
        return jnp.pad(a, ((0, b_ - a.shape[0]), (0, l_ - a.shape[1]),
                           (0, d_ - a.shape[2]))).astype(dtype)

    q_p = pad3(src_q, Bp, Lqp, Ep, jnp.float32)      # residual stays f32
    k_p = pad3(src_k, Bp, Lkp, Kdp, jnp.bfloat16)    # kernel only uses bf16 K/V
    v_p = pad3(src_v, Bp, Lkp, Vdp, jnp.bfloat16)

    # Additive key-padding mask: 0 on real keys, -1e30 on padded key rows.
    kbias = jnp.where(jnp.arange(Lkp) < Lk, 0.0, -1e30).astype(jnp.float32).reshape(1, Lkp)

    def act_spec(shape):
        return pl.BlockSpec(shape, lambda i: (i, 0, 0))

    def resident_spec(shape):
        # Constant block index across the batch grid axis -> fetched once, VMEM-resident.
        idx = lambda i: (0,) * len(shape)
        if single_buffer:
            return pl.BlockSpec(shape, idx, pipeline_mode=pl.Buffered(1))
        return pl.BlockSpec(shape, idx)

    cparams = pltpu.CompilerParams(
        dimension_semantics=("parallel",),
        vmem_limit_bytes=_VMEM_LIMIT,
    )

    # ---- pass 1: cross-attention + residual + norm ----
    attn_kernel = functools.partial(
        _attn_kernel,
        scaling=1.0 / math.sqrt(float(E)),    # head_dim == real embed dim (nhead=1)
        inv_e=1.0 / float(E),
        mask_keys=(Lk < Lkp),
    )
    src1 = pl.pallas_call(
        attn_kernel,
        out_shape=jax.ShapeDtypeStruct((Bp, Lqp, Ep), jnp.float32),
        grid_spec=pltpu.PrefetchScalarGridSpec(
            num_scalar_prefetch=0,
            grid=grid,
            in_specs=[
                act_spec((bt, Lqp, Ep)),
                act_spec((bt, Lkp, Kdp)),
                act_spec((bt, Lkp, Vdp)),
                resident_spec((Ep, Ep)),     # wq
                resident_spec((Kdp, Ep)),    # wk
                resident_spec((Vdp, Ep)),    # wv
                resident_spec((Ep, Ep)),     # wo
                resident_spec((8, Ep)),      # packed bq,bk,bv,bo,gn,bn
                resident_spec((1, Lkp)),     # key-padding additive bias
            ],
            out_specs=act_spec((bt, Lqp, Ep)),
        ),
        compiler_params=cparams,
    )(q_p, k_p, v_p,
      prepared["wq"], prepared["wk"], prepared["wv"], prepared["wo"],
      prepared["attn_vecs"], kbias)

    # ---- pass 2: FFN + residual + norm2 ----
    ffn_kernel = functools.partial(_ffn_kernel, inv_e=1.0 / float(E))
    out = pl.pallas_call(
        ffn_kernel,
        out_shape=jax.ShapeDtypeStruct((Bp, Lqp, Ep), jnp.float32),
        grid_spec=pltpu.PrefetchScalarGridSpec(
            num_scalar_prefetch=0,
            grid=grid,
            in_specs=[
                act_spec((bt, Lqp, Ep)),
                resident_spec((Ep, Ep)),     # w1
                resident_spec((Ep, Ep)),     # w2
                resident_spec((8, Ep)),      # packed b1,b2,gn2,bn2
            ],
            out_specs=act_spec((bt, Lqp, Ep)),
        ),
        compiler_params=cparams,
    )(src1, prepared["w1"], prepared["w2"], prepared["ffn_vecs"])

    return out[:B, :Lq, :E]


def transformer_encoder_layer(src_q, src_k, src_v, prepared):
    global _SINGLE_BUFFER_WEIGHTS
    try:
        return _forward(src_q, src_k, src_v, prepared, _SINGLE_BUFFER_WEIGHTS)
    except Exception:
        if not _SINGLE_BUFFER_WEIGHTS:
            raise
        # This Pallas build rejected pl.Buffered(1); use default pipelining instead.
        _SINGLE_BUFFER_WEIGHTS = False
        return _forward(src_q, src_k, src_v, prepared, False)


# --------------------------------------------------------------------------------------
# Pure-JAX reference (matches the PyTorch forward, dropout=0)
# --------------------------------------------------------------------------------------
def reference(src_q, src_k, src_v, params):
    (wq, bq, wk, bk, wv, bv, wo, bo, w1, b1, w2, b2, gn, bn, gn2, bn2) = params
    E = src_q.shape[-1]
    scaling = 1.0 / math.sqrt(float(E))

    q = jnp.einsum("ble,oe->blo", src_q, wq) + bq
    k = jnp.einsum("blk,ok->blo", src_k, wk) + bk
    v = jnp.einsum("blv,ov->blo", src_v, wv) + bv
    s = jnp.einsum("bqe,bke->bqk", q * scaling, k)
    p = jax.nn.softmax(s, axis=-1)
    attn = jnp.einsum("bqk,bke->bqe", p, v)
    attn = jnp.einsum("bqe,oe->bqo", attn, wo) + bo

    def ln(x, g, b):
        mu = jnp.mean(x, -1, keepdims=True)
        var = jnp.mean((x - mu) ** 2, -1, keepdims=True)
        return (x - mu) / jnp.sqrt(var + LN_EPS) * g + b

    src = ln(src_q + attn, gn, bn)
    h = jax.nn.gelu(jnp.einsum("bqe,oe->bqo", src, w1) + b1, approximate=False)
    ff = jnp.einsum("bqe,oe->bqo", h, w2) + b2
    return ln(src + ff, gn2, bn2)


if __name__ == "__main__":
    # Small shapes consistent with the module structure (d_model == dim_feedforward,
    # kdim == vdim != embed_dim, nhead = 1).  Real module uses 2051 / 262.
    B, Lq, Lk = 2, 8, 10
    E, Kd, Vd = 35, 19, 19   # "2048+3" / "256+6" style odd dims, scaled down

    key = jax.random.PRNGKey(0)
    ks = jax.random.split(key, 32)
    r = lambda i, shape, scale: (scale * jax.random.normal(ks[i], shape)).astype(jnp.float32)

    src_q = r(0, (B, Lq, E), 1.0)
    src_k = r(1, (B, Lk, Kd), 1.0)
    src_v = r(2, (B, Lk, Vd), 1.0)

    params = (
        r(3, (E, E), 1.0 / math.sqrt(E)),   r(4, (1, E), 0.02),    # q_proj_weight, bias_q
        r(5, (E, Kd), 1.0 / math.sqrt(Kd)), r(6, (1, E), 0.02),    # k_proj_weight, bias_k
        r(7, (E, Vd), 1.0 / math.sqrt(Vd)), r(8, (1, E), 0.02),    # v_proj_weight, bias_v
        r(9, (E, E), 1.0 / math.sqrt(E)),   r(10, (1, E), 0.02),   # out_proj
        r(11, (E, E), 1.0 / math.sqrt(E)),  r(12, (1, E), 0.02),   # linear1
        r(13, (E, E), 1.0 / math.sqrt(E)),  r(14, (1, E), 0.02),   # linear2
        jnp.ones((1, E), jnp.float32),  jnp.zeros((1, E), jnp.float32),   # norm
        jnp.ones((1, E), jnp.float32),  jnp.zeros((1, E), jnp.float32),   # norm2
    )

    # One-time parameter prep (hoisted out of the per-call path).
    prepared = prepare_params(params, E, Kd, Vd)

    out = transformer_encoder_layer(src_q, src_k, src_v, prepared)
    out = jax.block_until_ready(out)

    ref = reference(src_q, src_k, src_v, params)
    assert out.shape == (B, Lq, E)
    assert bool(jnp.all(jnp.isfinite(out)))
    # bf16 MXU inputs (f32 accumulation) bound the error; 2e-2 is a comfortable margin.
    np.testing.assert_allclose(np.asarray(out), np.asarray(ref), atol=2e-2, rtol=2e-2)

    print("KERNEL_OK")
</pallas_src>

<mosaic_0001>
module attributes {stable_mosaic.version = 11 : i64} {
  func.func @_attn_kernel(%arg0: i32, %arg1: memref<2x8x128xf32, #tpu.memory_space<vmem>>, %arg2: memref<2x128x128xbf16, #tpu.memory_space<vmem>>, %arg3: memref<2x128x128xbf16, #tpu.memory_space<vmem>>, %arg4: memref<128x128xbf16, #tpu.memory_space<vmem>>, %arg5: memref<128x128xbf16, #tpu.memory_space<vmem>>, %arg6: memref<128x128xbf16, #tpu.memory_space<vmem>>, %arg7: memref<128x128xbf16, #tpu.memory_space<vmem>>, %arg8: memref<8x128xf32, #tpu.memory_space<vmem>>, %arg9: memref<1x128xf32, #tpu.memory_space<vmem>>, %arg10: memref<2x8x128xf32, #tpu.memory_space<vmem>>) attributes {dimension_semantics = [#tpu.dimension_semantics<parallel>], iteration_bounds = array<i64: 1>, scalar_prefetch = 0 : i64, scratch_operands = 0 : i64, tpu.core_type = #tpu.core_type<tc>, window_params = [{transform_indices = @transform_0, window_bounds = array<i64: 2, 8, 128>}, {transform_indices = @transform_1, window_bounds = array<i64: 2, 128, 128>}, {transform_indices = @transform_2, window_bounds = array<i64: 2, 128, 128>}, {pipeline_mode = #tpu.pipeline_mode<synchronous>, transform_indices = @transform_3, window_bounds = array<i64: 128, 128>}, {pipeline_mode = #tpu.pipeline_mode<synchronous>, transform_indices = @transform_4, window_bounds = array<i64: 128, 128>}, {pipeline_mode = #tpu.pipeline_mode<synchronous>, transform_indices = @transform_5, window_bounds = array<i64: 128, 128>}, {pipeline_mode = #tpu.pipeline_mode<synchronous>, transform_indices = @transform_6, window_bounds = array<i64: 128, 128>}, {pipeline_mode = #tpu.pipeline_mode<synchronous>, transform_indices = @transform_7, window_bounds = array<i64: 8, 128>}, {pipeline_mode = #tpu.pipeline_mode<synchronous>, transform_indices = @transform_8, window_bounds = array<i64: 1, 128>}, {transform_indices = @transform_9, window_bounds = array<i64: 2, 8, 128>}]} {
    %c0 = arith.constant 0 : index
    %c0_0 = arith.constant 0 : index
    %c0_1 = arith.constant 0 : index
    %0 = vector.load %arg1[%c0, %c0_0, %c0_1] : memref<2x8x128xf32, #tpu.memory_space<vmem>>, vector<2x8x128xf32>
    %1 = vector.shape_cast %0 : vector<2x8x128xf32> to vector<16x128xf32>
    %2 = arith.truncf %1 : vector<16x128xf32> to vector<16x128xbf16>
    %c0_2 = arith.constant 0 : index
    %c0_3 = arith.constant 0 : index
    %3 = vector.load %arg8[%c0_2, %c0_3] : memref<8x128xf32, #tpu.memory_space<vmem>>, vector<8x128xf32>
    %4 = vector.extract_strided_slice %3 {offsets = [0, 0], sizes = [1, 128], strides = [1, 1]} : vector<8x128xf32> to vector<1x128xf32>
    %5 = vector.extract_strided_slice %3 {offsets = [1, 0], sizes = [1, 128], strides = [1, 1]} : vector<8x128xf32> to vector<1x128xf32>
    %6 = vector.extract_strided_slice %3 {offsets = [2, 0], sizes = [1, 128], strides = [1, 1]} : vector<8x128xf32> to vector<1x128xf32>
    %7 = vector.extract_strided_slice %3 {offsets = [3, 0], sizes = [1, 128], strides = [1, 1]} : vector<8x128xf32> to vector<1x128xf32>
    %8 = vector.extract_strided_slice %3 {offsets = [4, 0], sizes = [1, 128], strides = [1, 1]} : vector<8x128xf32> to vector<1x128xf32>
    %9 = vector.extract_strided_slice %3 {offsets = [5, 0], sizes = [1, 128], strides = [1, 1]} : vector<8x128xf32> to vector<1x128xf32>
    %c0_4 = arith.constant 0 : index
    %c0_5 = arith.constant 0 : index
    %10 = vector.load %arg4[%c0_4, %c0_5] : memref<128x128xbf16, #tpu.memory_space<vmem>>, vector<128x128xbf16>
    %cst = arith.constant dense<0.000000e+00> : vector<16x128xf32>
    %11 = tpu.matmul %2, %10, %cst {dimension_numbers = #tpu.dot_dimension_numbers<[1], [0], [0], [1], [0, 0, 1, 1], [], []>} : vector<16x128xbf16>, vector<128x128xbf16>, vector<16x128xf32> -> vector<16x128xf32>
    %12 = vector.broadcast %4 : vector<1x128xf32> to vector<16x128xf32>
    %13 = arith.addf %11, %12 : vector<16x128xf32>
    %c0_6 = arith.constant 0 : index
    %c0_7 = arith.constant 0 : index
    %c0_8 = arith.constant 0 : index
    %14 = vector.load %arg2[%c0_6, %c0_7, %c0_8] : memref<2x128x128xbf16, #tpu.memory_space<vmem>>, vector<2x128x128xbf16>
    %15 = vector.shape_cast %14 : vector<2x128x128xbf16> to vector<256x128xbf16>
    %c0_9 = arith.constant 0 : index
    %c0_10 = arith.constant 0 : index
    %16 = vector.load %arg5[%c0_9, %c0_10] : memref<128x128xbf16, #tpu.memory_space<vmem>>, vector<128x128xbf16>
    %cst_11 = arith.constant dense<0.000000e+00> : vector<256x128xf32>
    %17 = tpu.matmul %15, %16, %cst_11 {dimension_numbers = #tpu.dot_dimension_numbers<[1], [0], [0], [1], [0, 0, 1, 1], [], []>} : vector<256x128xbf16>, vector<128x128xbf16>, vector<256x128xf32> -> vector<256x128xf32>
    %18 = vector.broadcast %5 : vector<1x128xf32> to vector<256x128xf32>
    %19 = arith.addf %17, %18 : vector<256x128xf32>
    %c0_12 = arith.constant 0 : index
    %c0_13 = arith.constant 0 : index
    %c0_14 = arith.constant 0 : index
    %20 = vector.load %arg3[%c0_12, %c0_13, %c0_14] : memref<2x128x128xbf16, #tpu.memory_space<vmem>>, vector<2x128x128xbf16>
    %21 = vector.shape_cast %20 : vector<2x128x128xbf16> to vector<256x128xbf16>
    %c0_15 = arith.constant 0 : index
    %c0_16 = arith.constant 0 : index
    %22 = vector.load %arg6[%c0_15, %c0_16] : memref<128x128xbf16, #tpu.memory_space<vmem>>, vector<128x128xbf16>
    %cst_17 = arith.constant dense<0.000000e+00> : vector<256x128xf32>
    %23 = tpu.matmul %21, %22, %cst_17 {dimension_numbers = #tpu.dot_dimension_numbers<[1], [0], [0], [1], [0, 0, 1, 1], [], []>} : vector<256x128xbf16>, vector<128x128xbf16>, vector<256x128xf32> -> vector<256x128xf32>
    %24 = vector.broadcast %6 : vector<1x128xf32> to vector<256x128xf32>
    %25 = arith.addf %23, %24 : vector<256x128xf32>
    %cst_18 = arith.constant 0.169030845 : f32
    %26 = vector.broadcast %cst_18 : f32 to vector<16x128xf32>
    %27 = arith.mulf %13, %26 : vector<16x128xf32>
    %28 = vector.shape_cast %27 : vector<16x128xf32> to vector<2x8x128xf32>
    %29 = vector.shape_cast %19 : vector<256x128xf32> to vector<2x128x128xf32>
    %30 = vector.shape_cast %25 : vector<256x128xf32> to vector<2x128x128xf32>
    %31 = arith.truncf %28 : vector<2x8x128xf32> to vector<2x8x128xbf16>
    %32 = arith.truncf %29 : vector<2x128x128xf32> to vector<2x128x128xbf16>
    "tpu.trace_start"() <{level = 10 : i32, message = "bqe,bke->bqk"}> : () -> ()
    %cst_19 = arith.constant dense<0.000000e+00> : vector<2x8x128xf32>
    %33 = tpu.matmul %31, %32, %cst_19 {dimension_numbers = #tpu.dot_dimension_numbers<[2], [2], [1], [1], [0, 0, 0, 1, 1, 1], [0], [0]>} : vector<2x8x128xbf16>, vector<2x128x128xbf16>, vector<2x8x128xf32> -> vector<2x8x128xf32>
    "tpu.trace_stop"() : () -> ()
    %c0_20 = arith.constant 0 : index
    %c0_21 = arith.constant 0 : index
    %34 = vector.load %arg9[%c0_20, %c0_21] : memref<1x128xf32, #tpu.memory_space<vmem>>, vector<1x128xf32>
    %35 = vector.shape_cast %34 : vector<1x128xf32> to vector<1x1x128xf32>
    %36 = vector.broadcast %35 : vector<1x1x128xf32> to vector<2x8x128xf32>
    %37 = arith.addf %33, %36 : vector<2x8x128xf32>
    %cst_22 = arith.constant dense<0xFF800000> : vector<2x8xf32>
    %38 = vector.multi_reduction <maximumf>, %37, %cst_22 [2] : vector<2x8x128xf32> to vector<2x8xf32>
    %39 = vector.shape_cast %38 : vector<2x8xf32> to vector<2x8x1xf32>
    %40 = vector.broadcast %39 : vector<2x8x1xf32> to vector<2x8x128xf32>
    %41 = arith.subf %37, %40 : vector<2x8x128xf32>
    %42 = math.exp %41 : vector<2x8x128xf32>
    %cst_23 = arith.constant dense<0.000000e+00> : vector<2x8xf32>
    %43 = vector.multi_reduction <add>, %42, %cst_23 [2] : vector<2x8x128xf32> to vector<2x8xf32>
    %44 = vector.shape_cast %43 : vector<2x8xf32> to vector<2x8x1xf32>
    %45 = tpu.reciprocal %44 {approx = true} : vector<2x8x1xf32> -> vector<2x8x1xf32>
    %46 = vector.broadcast %45 : vector<2x8x1xf32> to vector<2x8x128xf32>
    %47 = arith.mulf %42, %46 : vector<2x8x128xf32>
    %48 = arith.truncf %47 : vector<2x8x128xf32> to vector<2x8x128xbf16>
    %49 = arith.truncf %30 : vector<2x128x128xf32> to vector<2x128x128xbf16>
    "tpu.trace_start"() <{level = 10 : i32, message = "bqk,bke->bqe"}> : () -> ()
    %cst_24 = arith.constant dense<0.000000e+00> : vector<2x8x128xf32>
    %50 = tpu.matmul %48, %49, %cst_24 {dimension_numbers = #tpu.dot_dimension_numbers<[2], [1], [1], [2], [0, 0, 0, 1, 1, 2], [0], [0]>} : vector<2x8x128xbf16>, vector<2x128x128xbf16>, vector<2x8x128xf32> -> vector<2x8x128xf32>
    "tpu.trace_stop"() : () -> ()
    %51 = vector.shape_cast %50 : vector<2x8x128xf32> to vector<16x128xf32>
    %52 = arith.truncf %51 : vector<16x128xf32> to vector<16x128xbf16>
    %c0_25 = arith.constant 0 : index
    %c0_26 = arith.constant 0 : index
    %53 = vector.load %arg7[%c0_25, %c0_26] : memref<128x128xbf16, #tpu.memory_space<vmem>>, vector<128x128xbf16>
    %cst_27 = arith.constant dense<0.000000e+00> : vector<16x128xf32>
    %54 = tpu.matmul %52, %53, %cst_27 {dimension_numbers = #tpu.dot_dimension_numbers<[1], [0], [0], [1], [0, 0, 1, 1], [], []>} : vector<16x128xbf16>, vector<128x128xbf16>, vector<16x128xf32> -> vector<16x128xf32>
    %55 = vector.broadcast %7 : vector<1x128xf32> to vector<16x128xf32>
    %56 = arith.addf %54, %55 : vector<16x128xf32>
    %57 = arith.addf %1, %56 : vector<16x128xf32>
    %cst_28 = arith.constant dense<0.000000e+00> : vector<16xf32>
    %58 = vector.multi_reduction <add>, %57, %cst_28 [1] : vector<16x128xf32> to vector<16xf32>
    %59 = vector.shape_cast %58 : vector<16xf32> to vector<16x1xf32>
    %cst_29 = arith.constant 0.0285714287 : f32
    %60 = vector.broadcast %cst_29 : f32 to vector<16x1xf32>
    %61 = arith.mulf %59, %60 : vector<16x1xf32>
    %62 = arith.mulf %57, %57 : vector<16x128xf32>
    %cst_30 = arith.constant dense<0.000000e+00> : vector<16xf32>
    %63 = vector.multi_reduction <add>, %62, %cst_30 [1] : vector<16x128xf32> to vector<16xf32>
    %64 = vector.shape_cast %63 : vector<16xf32> to vector<16x1xf32>
    %cst_31 = arith.constant 0.0285714287 : f32
    %65 = vector.broadcast %cst_31 : f32 to vector<16x1xf32>
    %66 = arith.mulf %64, %65 : vector<16x1xf32>
    %67 = arith.mulf %61, %61 : vector<16x1xf32>
    %68 = arith.subf %66, %67 : vector<16x1xf32>
    %cst_32 = arith.constant 0.000000e+00 : f32
    %69 = vector.broadcast %cst_32 : f32 to vector<16x1xf32>
    %70 = arith.maximumf %68, %69 : vector<16x1xf32>
    %71 = vector.broadcast %61 : vector<16x1xf32> to vector<16x128xf32>
    %72 = arith.subf %57, %71 : vector<16x128xf32>
    %cst_33 = arith.constant 9.99999974E-6 : f32
    %73 = vector.broadcast %cst_33 : f32 to vector<16x1xf32>
    %74 = arith.addf %70, %73 : vector<16x1xf32>
    %75 = math.rsqrt %74 : vector<16x1xf32>
    %76 = vector.broadcast %75 : vector<16x1xf32> to vector<16x128xf32>
    %77 = arith.mulf %72, %76 : vector<16x128xf32>
    %78 = vector.broadcast %8 : vector<1x128xf32> to vector<16x128xf32>
    %79 = arith.mulf %77, %78 : vector<16x128xf32>
    %80 = vector.broadcast %9 : vector<1x128xf32> to vector<16x128xf32>
    %81 = arith.addf %79, %80 : vector<16x128xf32>
    %82 = vector.shape_cast %81 : vector<16x128xf32> to vector<2x8x128xf32>
    %c0_34 = arith.constant 0 : index
    %c0_35 = arith.constant 0 : index
    %c0_36 = arith.constant 0 : index
    %83 = vector.load %arg10[%c0_34, %c0_35, %c0_36] : memref<2x8x128xf32, #tpu.memory_space<vmem>>, vector<2x8x128xf32>
    tpu.vector_store %arg10[%c0_34, %c0_35, %c0_36], %82 {strides = array<i32>} : memref<2x8x128xf32, #tpu.memory_space<vmem>>, vector<2x8x128xf32>,
    return
  }
  func.func @transform_0(%arg0: i32) -> (i32, i32, i32) {
    %c0_i32 = arith.constant 0 : i32
    %c0_i32_0 = arith.constant 0 : i32
    %c0_i32_1 = arith.constant 0 : i32
    return %arg0, %c0_i32, %c0_i32_0 : i32, i32, i32
  }
  func.func @transform_1(%arg0: i32) -> (i32, i32, i32) {
    %c0_i32 = arith.constant 0 : i32
    %c0_i32_0 = arith.constant 0 : i32
    %c0_i32_1 = arith.constant 0 : i32
    return %arg0, %c0_i32, %c0_i32_0 : i32, i32, i32
  }
  func.func @transform_2(%arg0: i32) -> (i32, i32, i32) {
    %c0_i32 = arith.constant 0 : i32
    %c0_i32_0 = arith.constant 0 : i32
    %c0_i32_1 = arith.constant 0 : i32
    return %arg0, %c0_i32, %c0_i32_0 : i32, i32, i32
  }
  func.func @transform_3(%arg0: i32) -> (i32, i32) {
    %c0_i32 = arith.constant 0 : i32
    %c0_i32_0 = arith.constant 0 : i32
    %c0_i32_1 = arith.constant 0 : i32
    return %c0_i32, %c0_i32_0 : i32, i32
  }
  func.func @transform_4(%arg0: i32) -> (i32, i32) {
    %c0_i32 = arith.constant 0 : i32
    %c0_i32_0 = arith.constant 0 : i32
    %c0_i32_1 = arith.constant 0 : i32
    return %c0_i32, %c0_i32_0 : i32, i32
  }
  func.func @transform_5(%arg0: i32) -> (i32, i32) {
    %c0_i32 = arith.constant 0 : i32
    %c0_i32_0 = arith.constant 0 : i32
    %c0_i32_1 = arith.constant 0 : i32
    return %c0_i32, %c0_i32_0 : i32, i32
  }
  func.func @transform_6(%arg0: i32) -> (i32, i32) {
    %c0_i32 = arith.constant 0 : i32
    %c0_i32_0 = arith.constant 0 : i32
    %c0_i32_1 = arith.constant 0 : i32
    return %c0_i32, %c0_i32_0 : i32, i32
  }
  func.func @transform_7(%arg0: i32) -> (i32, i32) {
    %c0_i32 = arith.constant 0 : i32
    %c0_i32_0 = arith.constant 0 : i32
    %c0_i32_1 = arith.constant 0 : i32
    return %c0_i32, %c0_i32_0 : i32, i32
  }
  func.func @transform_8(%arg0: i32) -> (i32, i32) {
    %c0_i32 = arith.constant 0 : i32
    %c0_i32_0 = arith.constant 0 : i32
    %c0_i32_1 = arith.constant 0 : i32
    return %c0_i32, %c0_i32_0 : i32, i32
  }
  func.func @transform_9(%arg0: i32) -> (i32, i32, i32) {
    %c0_i32 = arith.constant 0 : i32
    %c0_i32_0 = arith.constant 0 : i32
    %c0_i32_1 = arith.constant 0 : i32
    return %arg0, %c0_i32, %c0_i32_0 : i32, i32, i32
  }
}

module attributes {stable_mosaic.version = 11 : i64} {
  func.func @_attn_kernel(%arg0: i32, %arg1: memref<2x8x128xf32, #tpu.memory_space<vmem>>, %arg2: memref<2x128x128xbf16, #tpu.memory_space<vmem>>, %arg3: memref<2x128x128xbf16, #tpu.memory_space<vmem>>, %arg4: memref<128x128xbf16, #tpu.memory_space<vmem>>, %arg5: memref<128x128xbf16, #tpu.memory_space<vmem>>, %arg6: memref<128x128xbf16, #tpu.memory_space<vmem>>, %arg7: memref<128x128xbf16, #tpu.memory_space<vmem>>, %arg8: memref<8x128xf32, #tpu.memory_space<vmem>>, %arg9: memref<1x128xf32, #tpu.memory_space<vmem>>, %arg10: memref<2x8x128xf32, #tpu.memory_space<vmem>>) attributes {dimension_semantics = [#tpu.dimension_semantics<parallel>], iteration_bounds = array<i64: 1>, scalar_prefetch = 0 : i64, scratch_operands = 0 : i64, tpu.core_type = #tpu.core_type<tc>, window_params = [{transform_indices = @transform_0, window_bounds = array<i64: 2, 8, 128>}, {transform_indices = @transform_1, window_bounds = array<i64: 2, 128, 128>}, {transform_indices = @transform_2, window_bounds = array<i64: 2, 128, 128>}, {pipeline_mode = #tpu.pipeline_mode<synchronous>, transform_indices = @transform_3, window_bounds = array<i64: 128, 128>}, {pipeline_mode = #tpu.pipeline_mode<synchronous>, transform_indices = @transform_4, window_bounds = array<i64: 128, 128>}, {pipeline_mode = #tpu.pipeline_mode<synchronous>, transform_indices = @transform_5, window_bounds = array<i64: 128, 128>}, {pipeline_mode = #tpu.pipeline_mode<synchronous>, transform_indices = @transform_6, window_bounds = array<i64: 128, 128>}, {pipeline_mode = #tpu.pipeline_mode<synchronous>, transform_indices = @transform_7, window_bounds = array<i64: 8, 128>}, {pipeline_mode = #tpu.pipeline_mode<synchronous>, transform_indices = @transform_8, window_bounds = array<i64: 1, 128>}, {transform_indices = @transform_9, window_bounds = array<i64: 2, 8, 128>}]} {
    %c0 = arith.constant 0 : index
    %c0_0 = arith.constant 0 : index
    %c0_1 = arith.constant 0 : index
    %0 = vector.load %arg1[%c0, %c0_0, %c0_1] : memref<2x8x128xf32, #tpu.memory_space<vmem>>, vector<2x8x128xf32>
    %1 = vector.shape_cast %0 : vector<2x8x128xf32> to vector<16x128xf32>
    %2 = arith.truncf %1 : vector<16x128xf32> to vector<16x128xbf16>
    %c0_2 = arith.constant 0 : index
    %c0_3 = arith.constant 0 : index
    %3 = vector.load %arg8[%c0_2, %c0_3] : memref<8x128xf32, #tpu.memory_space<vmem>>, vector<8x128xf32>
    %4 = vector.extract_strided_slice %3 {offsets = [0, 0], sizes = [1, 128], strides = [1, 1]} : vector<8x128xf32> to vector<1x128xf32>
    %5 = vector.extract_strided_slice %3 {offsets = [1, 0], sizes = [1, 128], strides = [1, 1]} : vector<8x128xf32> to vector<1x128xf32>
    %6 = vector.extract_strided_slice %3 {offsets = [2, 0], sizes = [1, 128], strides = [1, 1]} : vector<8x128xf32> to vector<1x128xf32>
    %7 = vector.extract_strided_slice %3 {offsets = [3, 0], sizes = [1, 128], strides = [1, 1]} : vector<8x128xf32> to vector<1x128xf32>
    %8 = vector.extract_strided_slice %3 {offsets = [4, 0], sizes = [1, 128], strides = [1, 1]} : vector<8x128xf32> to vector<1x128xf32>
    %9 = vector.extract_strided_slice %3 {offsets = [5, 0], sizes = [1, 128], strides = [1, 1]} : vector<8x128xf32> to vector<1x128xf32>
    %c0_4 = arith.constant 0 : index
    %c0_5 = arith.constant 0 : index
    %10 = vector.load %arg4[%c0_4, %c0_5] : memref<128x128xbf16, #tpu.memory_space<vmem>>, vector<128x128xbf16>
    %cst = arith.constant dense<0.000000e+00> : vector<16x128xf32>
    %11 = tpu.matmul %2, %10, %cst {dimension_numbers = #tpu.dot_dimension_numbers<[1], [0], [0], [1], [0, 0, 1, 1], [], []>} : vector<16x128xbf16>, vector<128x128xbf16>, vector<16x128xf32> -> vector<16x128xf32>
    %12 = vector.broadcast %4 : vector<1x128xf32> to vector<16x128xf32>
    %13 = arith.addf %11, %12 : vector<16x128xf32>
    %c0_6 = arith.constant 0 : index
    %c0_7 = arith.constant 0 : index
    %c0_8 = arith.constant 0 : index
    %14 = vector.load %arg2[%c0_6, %c0_7, %c0_8] : memref<2x128x128xbf16, #tpu.memory_space<vmem>>, vector<2x128x128xbf16>
    %15 = vector.shape_cast %14 : vector<2x128x128xbf16> to vector<256x128xbf16>
    %c0_9 = arith.constant 0 : index
    %c0_10 = arith.constant 0 : index
    %16 = vector.load %arg5[%c0_9, %c0_10] : memref<128x128xbf16, #tpu.memory_space<vmem>>, vector<128x128xbf16>
    %cst_11 = arith.constant dense<0.000000e+00> : vector<256x128xf32>
    %17 = tpu.matmul %15, %16, %cst_11 {dimension_numbers = #tpu.dot_dimension_numbers<[1], [0], [0], [1], [0, 0, 1, 1], [], []>} : vector<256x128xbf16>, vector<128x128xbf16>, vector<256x128xf32> -> vector<256x128xf32>
    %18 = vector.broadcast %5 : vector<1x128xf32> to vector<256x128xf32>
    %19 = arith.addf %17, %18 : vector<256x128xf32>
    %c0_12 = arith.constant 0 : index
    %c0_13 = arith.constant 0 : index
    %c0_14 = arith.constant 0 : index
    %20 = vector.load %arg3[%c0_12, %c0_13, %c0_14] : memref<2x128x128xbf16, #tpu.memory_space<vmem>>, vector<2x128x128xbf16>
    %21 = vector.shape_cast %20 : vector<2x128x128xbf16> to vector<256x128xbf16>
    %c0_15 = arith.constant 0 : index
    %c0_16 = arith.constant 0 : index
    %22 = vector.load %arg6[%c0_15, %c0_16] : memref<128x128xbf16, #tpu.memory_space<vmem>>, vector<128x128xbf16>
    %cst_17 = arith.constant dense<0.000000e+00> : vector<256x128xf32>
    %23 = tpu.matmul %21, %22, %cst_17 {dimension_numbers = #tpu.dot_dimension_numbers<[1], [0], [0], [1], [0, 0, 1, 1], [], []>} : vector<256x128xbf16>, vector<128x128xbf16>, vector<256x128xf32> -> vector<256x128xf32>
    %24 = vector.broadcast %6 : vector<1x128xf32> to vector<256x128xf32>
    %25 = arith.addf %23, %24 : vector<256x128xf32>
    %cst_18 = arith.constant 0.169030845 : f32
    %26 = vector.broadcast %cst_18 : f32 to vector<16x128xf32>
    %27 = arith.mulf %13, %26 : vector<16x128xf32>
    %28 = vector.shape_cast %27 : vector<16x128xf32> to vector<2x8x128xf32>
    %29 = vector.shape_cast %19 : vector<256x128xf32> to vector<2x128x128xf32>
    %30 = vector.shape_cast %25 : vector<256x128xf32> to vector<2x128x128xf32>
    %31 = arith.truncf %28 : vector<2x8x128xf32> to vector<2x8x128xbf16>
    %32 = arith.truncf %29 : vector<2x128x128xf32> to vector<2x128x128xbf16>
    "tpu.trace_start"() <{level = 10 : i32, message = "bqe,bke->bqk"}> : () -> ()
    %cst_19 = arith.constant dense<0.000000e+00> : vector<2x8x128xf32>
    %33 = tpu.matmul %31, %32, %cst_19 {dimension_numbers = #tpu.dot_dimension_numbers<[2], [2], [1], [1], [0, 0, 0, 1, 1, 1], [0], [0]>} : vector<2x8x128xbf16>, vector<2x128x128xbf16>, vector<2x8x128xf32> -> vector<2x8x128xf32>
    "tpu.trace_stop"() : () -> ()
    %c0_20 = arith.constant 0 : index
    %c0_21 = arith.constant 0 : index
    %34 = vector.load %arg9[%c0_20, %c0_21] : memref<1x128xf32, #tpu.memory_space<vmem>>, vector<1x128xf32>
    %35 = vector.shape_cast %34 : vector<1x128xf32> to vector<1x1x128xf32>
    %36 = vector.broadcast %35 : vector<1x1x128xf32> to vector<2x8x128xf32>
    %37 = arith.addf %33, %36 : vector<2x8x128xf32>
    %cst_22 = arith.constant dense<0xFF800000> : vector<2x8xf32>
    %38 = vector.multi_reduction <maximumf>, %37, %cst_22 [2] : vector<2x8x128xf32> to vector<2x8xf32>
    %39 = vector.shape_cast %38 : vector<2x8xf32> to vector<2x8x1xf32>
    %40 = vector.broadcast %39 : vector<2x8x1xf32> to vector<2x8x128xf32>
    %41 = arith.subf %37, %40 : vector<2x8x128xf32>
    %42 = math.exp %41 : vector<2x8x128xf32>
    %cst_23 = arith.constant dense<0.000000e+00> : vector<2x8xf32>
    %43 = vector.multi_reduction <add>, %42, %cst_23 [2] : vector<2x8x128xf32> to vector<2x8xf32>
    %44 = vector.shape_cast %43 : vector<2x8xf32> to vector<2x8x1xf32>
    %45 = tpu.reciprocal %44 {approx = true} : vector<2x8x1xf32> -> vector<2x8x1xf32>
    %46 = vector.broadcast %45 : vector<2x8x1xf32> to vector<2x8x128xf32>
    %47 = arith.mulf %42, %46 : vector<2x8x128xf32>
    %48 = arith.truncf %47 : vector<2x8x128xf32> to vector<2x8x128xbf16>
    %49 = arith.truncf %30 : vector<2x128x128xf32> to vector<2x128x128xbf16>
    "tpu.trace_start"() <{level = 10 : i32, message = "bqk,bke->bqe"}> : () -> ()
    %cst_24 = arith.constant dense<0.000000e+00> : vector<2x8x128xf32>
    %50 = tpu.matmul %48, %49, %cst_24 {dimension_numbers = #tpu.dot_dimension_numbers<[2], [1], [1], [2], [0, 0, 0, 1, 1, 2], [0], [0]>} : vector<2x8x128xbf16>, vector<2x128x128xbf16>, vector<2x8x128xf32> -> vector<2x8x128xf32>
    "tpu.trace_stop"() : () -> ()
    %51 = vector.shape_cast %50 : vector<2x8x128xf32> to vector<16x128xf32>
    %52 = arith.truncf %51 : vector<16x128xf32> to vector<16x128xbf16>
    %c0_25 = arith.constant 0 : index
    %c0_26 = arith.constant 0 : index
    %53 = vector.load %arg7[%c0_25, %c0_26] : memref<128x128xbf16, #tpu.memory_space<vmem>>, vector<128x128xbf16>
    %cst_27 = arith.constant dense<0.000000e+00> : vector<16x128xf32>
    %54 = tpu.matmul %52, %53, %cst_27 {dimension_numbers = #tpu.dot_dimension_numbers<[1], [0], [0], [1], [0, 0, 1, 1], [], []>} : vector<16x128xbf16>, vector<128x128xbf16>, vector<16x128xf32> -> vector<16x128xf32>
    %55 = vector.broadcast %7 : vector<1x128xf32> to vector<16x128xf32>
    %56 = arith.addf %54, %55 : vector<16x128xf32>
    %57 = arith.addf %1, %56 : vector<16x128xf32>
    %cst_28 = arith.constant dense<0.000000e+00> : vector<16xf32>
    %58 = vector.multi_reduction <add>, %57, %cst_28 [1] : vector<16x128xf32> to vector<16xf32>
    %59 = vector.shape_cast %58 : vector<16xf32> to vector<16x1xf32>
    %cst_29 = arith.constant 0.0285714287 : f32
    %60 = vector.broadcast %cst_29 : f32 to vector<16x1xf32>
    %61 = arith.mulf %59, %60 : vector<16x1xf32>
    %62 = arith.mulf %57, %57 : vector<16x128xf32>
    %cst_30 = arith.constant dense<0.000000e+00> : vector<16xf32>
    %63 = vector.multi_reduction <add>, %62, %cst_30 [1] : vector<16x128xf32> to vector<16xf32>
    %64 = vector.shape_cast %63 : vector<16xf32> to vector<16x1xf32>
    %cst_31 = arith.constant 0.0285714287 : f32
    %65 = vector.broadcast %cst_31 : f32 to vector<16x1xf32>
    %66 = arith.mulf %64, %65 : vector<16x1xf32>
    %67 = arith.mulf %61, %61 : vector<16x1xf32>
    %68 = arith.subf %66, %67 : vector<16x1xf32>
    %cst_32 = arith.constant 0.000000e+00 : f32
    %69 = vector.broadcast %cst_32 : f32 to vector<16x1xf32>
    %70 = arith.maximumf %68, %69 : vector<16x1xf32>
    %71 = vector.broadcast %61 : vector<16x1xf32> to vector<16x128xf32>
    %72 = arith.subf %57, %71 : vector<16x128xf32>
    %cst_33 = arith.constant 9.99999974E-6 : f32
    %73 = vector.broadcast %cst_33 : f32 to vector<16x1xf32>
    %74 = arith.addf %70, %73 : vector<16x1xf32>
    %75 = math.rsqrt %74 : vector<16x1xf32>
    %76 = vector.broadcast %75 : vector<16x1xf32> to vector<16x128xf32>
    %77 = arith.mulf %72, %76 : vector<16x128xf32>
    %78 = vector.broadcast %8 : vector<1x128xf32> to vector<16x128xf32>
    %79 = arith.mulf %77, %78 : vector<16x128xf32>
    %80 = vector.broadcast %9 : vector<1x128xf32> to vector<16x128xf32>
    %81 = arith.addf %79, %80 : vector<16x128xf32>
    %82 = vector.shape_cast %81 : vector<16x128xf32> to vector<2x8x128xf32>
    %c0_34 = arith.constant 0 : index
    %c0_35 = arith.constant 0 : index
    %c0_36 = arith.constant 0 : index
    %83 = vector.load %arg10[%c0_34, %c0_35, %c0_36] : memref<2x8x128xf32, #tpu.memory_space<vmem>>, vector<2x8x128xf32>
    tpu.vector_store %arg10[%c0_34, %c0_35, %c0_36], %82 {strides = array<i32>} : memref<2x8x128xf32, #tpu.memory_space<vmem>>, vector<2x8x128xf32>,
    return
  }
  func.func @transform_0(%arg0: i32) -> (i32, i32, i32) {
    %c0_i32 = arith.constant 0 : i32
    %c0_i32_0 = arith.constant 0 : i32
    %c0_i32_1 = arith.constant 0 : i32
    return %arg0, %c0_i32, %c0_i32_0 : i32, i32, i32
  }
  func.func @transform_1(%arg0: i32) -> (i32, i32, i32) {
    %c0_i32 = arith.constant 0 : i32
    %c0_i32_0 = arith.constant 0 : i32
    %c0_i32_1 = arith.constant 0 : i32
    return %arg0, %c0_i32, %c0_i32_0 : i32, i32, i32
  }
  func.func @transform_2(%arg0: i32) -> (i32, i32, i32) {
    %c0_i32 = arith.constant 0 : i32
    %c0_i32_0 = arith.constant 0 : i32
    %c0_i32_1 = arith.constant 0 : i32
    return %arg0, %c0_i32, %c0_i32_0 : i32, i32, i32
  }
  func.func @transform_3(%arg0: i32) -> (i32, i32) {
    %c0_i32 = arith.constant 0 : i32
    %c0_i32_0 = arith.constant 0 : i32
    %c0_i32_1 = arith.constant 0 : i32
    return %c0_i32, %c0_i32_0 : i32, i32
  }
  func.func @transform_4(%arg0: i32) -> (i32, i32) {
    %c0_i32 = arith.constant 0 : i32
    %c0_i32_0 = arith.constant 0 : i32
    %c0_i32_1 = arith.constant 0 : i32
    return %c0_i32, %c0_i32_0 : i32, i32
  }
  func.func @transform_5(%arg0: i32) -> (i32, i32) {
    %c0_i32 = arith.constant 0 : i32
    %c0_i32_0 = arith.constant 0 : i32
    %c0_i32_1 = arith.constant 0 : i32
    return %c0_i32, %c0_i32_0 : i32, i32
  }
  func.func @transform_6(%arg0: i32) -> (i32, i32) {
    %c0_i32 = arith.constant 0 : i32
    %c0_i32_0 = arith.constant 0 : i32
    %c0_i32_1 = arith.constant 0 : i32
    return %c0_i32, %c0_i32_0 : i32, i32
  }
  func.func @transform_7(%arg0: i32) -> (i32, i32) {
    %c0_i32 = arith.constant 0 : i32
    %c0_i32_0 = arith.constant 0 : i32
    %c0_i32_1 = arith.constant 0 : i32
    return %c0_i32, %c0_i32_0 : i32, i32
  }
  func.func @transform_8(%arg0: i32) -> (i32, i32) {
    %c0_i32 = arith.constant 0 : i32
    %c0_i32_0 = arith.constant 0 : i32
    %c0_i32_1 = arith.constant 0 : i32
    return %c0_i32, %c0_i32_0 : i32, i32
  }
  func.func @transform_9(%arg0: i32) -> (i32, i32, i32) {
    %c0_i32 = arith.constant 0 : i32
    %c0_i32_0 = arith.constant 0 : i32
    %c0_i32_1 = arith.constant 0 : i32
    return %arg0, %c0_i32, %c0_i32_0 : i32, i32, i32
  }
}

</mosaic_0001>

<bundles_post_ra>
// kernel: tpu_custom_call.1
= control target key start
LH: loop header
LB: loop body
LE: loop exit
PB: predicated region body
PF: predicated region fallthrough
CT: control target
= control target key end

     0   :  { %14 = vsyncpa [#allocation3], 0  ;;  %s2458_s0 = inlined_call_operand.hbm [shape: f32[2,8,128], index: 0, kind: input, shape index: {}]   ;;  %s2459_s1 = inlined_call_operand.hbm [shape: bf16[2,128,128], index: 1, kind: input, shape index: {}]   ;;  %s2460_s2 = inlined_call_operand.hbm [shape: bf16[2,128,128], index: 2, kind: input, shape index: {}]   ;;  %s2461_s3 = inlined_call_operand.hbm [shape: bf16[128,128], index: 3, kind: input, shape index: {}]   ;;  %s2462_s4 = inlined_call_operand.hbm [shape: bf16[128,128], index: 4, kind: input, shape index: {}]   ;;  %s2463_s5 = inlined_call_operand.hbm [shape: bf16[128,128], index: 5, kind: input, shape index: {}]   ;;  %s2464_s6 = inlined_call_operand.hbm [shape: bf16[128,128], index: 6, kind: input, shape index: {}]   ;;  %s2465_s7 = inlined_call_operand.hbm [shape: f32[8,128], index: 7, kind: input, shape index: {}]   ;;  %s2466_s8 = inlined_call_operand.hbm [shape: f32[1,128], index: 8, kind: input, shape index: {}]   ;;  %s2467_s9 = inlined_call_operand.hbm [shape: f32[2,8,128], index: 9, kind: output, shape index: {}]  }
   0x1   :  { %15 = vsyncpa [#allocation6], 0 }
   0x2   :  { %16 = vsyncpa [#allocation9], 0 }
   0x3   :  { %17 = vsyncpa [#allocation12], 0 }
   0x4   :  { %18 = vsyncpa [#allocation15], 0 }
   0x5   :  { %19 = vsyncpa [#allocation4], 0  ;;  %s2084_s30 = smov [#allocation5]   ;;  %s1852_s13 = scalar_lea.hbm %s2459_s1, 2048 }
   0x6   :  { %s37_s10 = sshll.u32 %s2084_s30, 4  ;;  %p1853_p0 = scmp.ne.s32.totalorder %s2459_s1, %s1852_s13  ;;  %s38_s10 = int_to_ptr.vmem [resolvable:$true] %s37_s10 }
   0x7   :  { %p1856_p1 = scmp.lt.u32.totalorder %s1852_s13, %s2459_s1 }
   0x9   :  { %p1858_p2 = pnand %p1856_p1, %p1853_p0 }
   0xb   :  { %1861 = shalt.err (!%p1858_p2)
}
   0xc   :  { %s1862_s18 = scalar_lea.vmem %s38_s10, 2048  ;;  %p1867_p4 = scmp.lt.s32.totalorder %s38_s10, %s38_s10 }
   0xd   :  { %p1863_p3 = scmp.ne.s32.totalorder %s38_s10, %s1862_s18  ;;  %p1868_p5 = scmp.lt.s32.totalorder %s1862_s18, %s1862_s18 }
   0xf   :  { %p1869_p6 = por %p1868_p5, %p1867_p4 }
  0x11   :  { %p1870_p7 = pnand %p1869_p6, %p1863_p3 }
  0x13   :  { %1873 = shalt.err (!%p1870_p7)
}
  0x14   :  { %s2085_s19 = smov 64   ;;  %s2086_s20 = smov 4  }
  0x15   :  { %43 = dma.hbm_to_vmem [thread:$0]  %s2459_s1, 2048, %s38_s10, [#allocation6], %s2085_s19, %s2085_s19, %s2086_s20  }
  0x16   :  { %s2087_s23 = smov [#allocation8]   ;;  %s2088_s25 = smov [#allocation11]  }
  0x17   :  { %s61_s24 = sshll.u32 %s2087_s23, 4  ;;  %s85_s26 = sshll.u32 %s2088_s25, 4  ;;  %s62_s24 = int_to_ptr.vmem [resolvable:$true] %s61_s24  ;;  %s86_s26 = int_to_ptr.vmem [resolvable:$true] %s85_s26 }
  0x18   :  { %s1874_s29 = scalar_lea.hbm %s2461_s3, 1024 }
  0x19   :  { %p1875_p8 = scmp.ne.s32.totalorder %s2461_s3, %s1874_s29  ;;  %p1878_p9 = scmp.lt.u32.totalorder %s1874_s29, %s2461_s3 }
  0x1b   :  { %p1880_p10 = pnand %p1878_p9, %p1875_p8 }
  0x1d   :  { %1883 = shalt.err (!%p1880_p10)
}
  0x1e   :  { %s1884_s1 = scalar_lea.vmem %s62_s24, 1024  ;;  %p1889_p12 = scmp.lt.s32.totalorder %s62_s24, %s62_s24 }
  0x1f   :  { %p1885_p11 = scmp.ne.s32.totalorder %s62_s24, %s1884_s1  ;;  %p1890_p13 = scmp.lt.s32.totalorder %s1884_s1, %s1884_s1 }
  0x21   :  { %p1891_p0 = por %p1890_p13, %p1889_p12 }
  0x23   :  { %p1892_p1 = pnand %p1891_p0, %p1885_p11 }
  0x25   :  { %1895 = shalt.err (!%p1892_p1)
}
  0x26   :  { %67 = dma.hbm_to_vmem [thread:$0]  %s2461_s3, 1024, %s62_s24, [#allocation9], %s2085_s19, %s2085_s19, %s2086_s20  }
  0x27   :  { %s1896_s17 = scalar_lea.hbm %s2463_s5, 1024 }
  0x28   :  { %p1897_p2 = scmp.ne.s32.totalorder %s2463_s5, %s1896_s17  ;;  %p1900_p3 = scmp.lt.u32.totalorder %s1896_s17, %s2463_s5 }
  0x2a   :  { %p1902_p4 = pnand %p1900_p3, %p1897_p2 }
  0x2c   :  { %1905 = shalt.err (!%p1902_p4)
}
  0x2d   :  { %s1906_s25 = scalar_lea.vmem %s86_s26, 1024  ;;  %p1911_p6 = scmp.lt.s32.totalorder %s86_s26, %s86_s26 }
  0x2e   :  { %p1907_p5 = scmp.ne.s32.totalorder %s86_s26, %s1906_s25  ;;  %p1912_p7 = scmp.lt.s32.totalorder %s1906_s25, %s1906_s25 }
  0x30   :  { %p1913_p8 = por %p1912_p7, %p1911_p6 }
  0x32   :  { %p1914_p9 = pnand %p1913_p8, %p1907_p5 }
  0x34   :  { %1917 = shalt.err (!%p1914_p9)
}
  0x35   :  { %91 = dma.hbm_to_vmem [thread:$0]  %s2463_s5, 1024, %s86_s26, [#allocation12], %s2085_s19, %s2085_s19, %s2086_s20  }
  0x36   :  { %s2089_s27 = smov [#allocation14]   ;;  %s2090_s29 = smov [#allocation2]  }
  0x37   :  { %s110_s28 = sshll.u32 %s2089_s27, 4  ;;  %s25_s30 = sshll.u32 %s2090_s29, 4  ;;  %s111_s28 = int_to_ptr.vmem [resolvable:$true] %s110_s28  ;;  %s26_s30 = int_to_ptr.vmem [resolvable:$true] %s25_s30 }
  0x38   :  { %s1918_s13 = scalar_lea.hbm %s2465_s7, 128 }
  0x39   :  { %p1919_p10 = scmp.ne.s32.totalorder %s2465_s7, %s1918_s13  ;;  %p1922_p11 = scmp.lt.u32.totalorder %s1918_s13, %s2465_s7 }
  0x3b   :  { %p1924_p12 = pnand %p1922_p11, %p1919_p10 }
  0x3d   :  { %1927 = shalt.err (!%p1924_p12)
}
  0x3e   :  { %s1928_s5 = scalar_lea.vmem %s111_s28, 128  ;;  %p1933_p0 = scmp.lt.s32.totalorder %s111_s28, %s111_s28 }
  0x3f   :  { %p1929_p13 = scmp.ne.s32.totalorder %s111_s28, %s1928_s5  ;;  %p1934_p1 = scmp.lt.s32.totalorder %s1928_s5, %s1928_s5 }
  0x41   :  { %p1935_p2 = por %p1934_p1, %p1933_p0 }
  0x43   :  { %p1936_p3 = pnand %p1935_p2, %p1929_p13 }
  0x45   :  { %1939 = shalt.err (!%p1936_p3)
}
  0x46   :  { %113 = dma.hbm_to_vmem [thread:$0]  %s2465_s7, 128, %s111_s28, [#allocation15]  }
  0x47   :  { %s1940_s21 = scalar_lea.hbm %s2458_s0, 256 }
  0x48   :  { %p1941_p4 = scmp.ne.s32.totalorder %s2458_s0, %s1940_s21  ;;  %p1944_p5 = scmp.lt.u32.totalorder %s1940_s21, %s2458_s0 }
  0x4a   :  { %p1946_p6 = pnand %p1944_p5, %p1941_p4 }
  0x4c   :  { %1949 = shalt.err (!%p1946_p6)
}
  0x4d   :  { %s1950_s24 = scalar_lea.vmem %s26_s30, 256  ;;  %p1955_p8 = scmp.lt.s32.totalorder %s26_s30, %s26_s30 }
  0x4e   :  { %p1951_p7 = scmp.ne.s32.totalorder %s26_s30, %s1950_s24  ;;  %p1956_p9 = scmp.lt.s32.totalorder %s1950_s24, %s1950_s24 }
  0x50   :  { %p1957_p10 = por %p1956_p9, %p1955_p8 }
  0x52   :  { %p1958_p11 = pnand %p1957_p10, %p1951_p7 }
  0x54   :  { %1961 = shalt.err (!%p1958_p11)
}
  0x55   :  { %s2091_s7 = smov 128   ;;  %s2092_s27 = smov 8  }
  0x56   :  { %31 = dma.hbm_to_vmem [thread:$0]  %s2458_s0, 256, %s26_s30, [#allocation3], %s2091_s7, %s2091_s7, %s2092_s27  }
  0x57   :  { %s2093_s11 = smov [#allocation7]   ;;  %s2094_s13 = smov [#allocation10]  }
  0x58   :  { %s49_s12 = sshll.u32 %s2093_s11, 4  ;;  %s73_s1 = sshll.u32 %s2094_s13, 4  ;;  %s50_s12 = int_to_ptr.vmem [resolvable:$true] %s49_s12  ;;  %s74_s1 = int_to_ptr.vmem [resolvable:$true] %s73_s1 }
  0x59   :  { %s1962_s15 = scalar_lea.hbm %s2460_s2, 2048 }
  0x5a   :  { %p1963_p12 = scmp.ne.s32.totalorder %s2460_s2, %s1962_s15  ;;  %p1966_p13 = scmp.lt.u32.totalorder %s1962_s15, %s2460_s2 }
  0x5c   :  { %p1968_p0 = pnand %p1966_p13, %p1963_p12 }
  0x5e   :  { %1971 = shalt.err (!%p1968_p0)
}
  0x5f   :  { %s1972_s0 = scalar_lea.vmem %s50_s12, 2048  ;;  %p1977_p2 = scmp.lt.s32.totalorder %s50_s12, %s50_s12 }
  0x60   :  { %p1973_p1 = scmp.ne.s32.totalorder %s50_s12, %s1972_s0  ;;  %p1978_p3 = scmp.lt.s32.totalorder %s1972_s0, %s1972_s0 }
  0x62   :  { %p1979_p4 = por %p1978_p3, %p1977_p2 }
  0x64   :  { %p1980_p5 = pnand %p1979_p4, %p1973_p1 }
  0x66   :  { %1983 = shalt.err (!%p1980_p5)
}
  0x67   :  { %55 = dma.hbm_to_vmem [thread:$0]  %s2460_s2, 2048, %s50_s12, [#allocation6], %s2085_s19, %s2085_s19, %s2086_s20  }
  0x68   :  { %s1984_s23 = scalar_lea.hbm %s2462_s4, 1024 }
  0x69   :  { %p1985_p6 = scmp.ne.s32.totalorder %s2462_s4, %s1984_s23  ;;  %p1988_p7 = scmp.lt.u32.totalorder %s1984_s23, %s2462_s4 }
  0x6b   :  { %p1990_p8 = pnand %p1988_p7, %p1985_p6 }
  0x6d   :  { %1993 = shalt.err (!%p1990_p8)
}
  0x6e   :  { %s1994_s29 = scalar_lea.vmem %s74_s1, 1024  ;;  %p1999_p10 = scmp.lt.s32.totalorder %s74_s1, %s74_s1 }
  0x6f   :  { %p1995_p9 = scmp.ne.s32.totalorder %s74_s1, %s1994_s29  ;;  %p2000_p11 = scmp.lt.s32.totalorder %s1994_s29, %s1994_s29 }
  0x71   :  { %p2001_p12 = por %p2000_p11, %p1999_p10 }
  0x73   :  { %p2002_p13 = pnand %p2001_p12, %p1995_p9 }
  0x75   :  { %2005 = shalt.err (!%p2002_p13)
}
  0x76   :  { %79 = dma.hbm_to_vmem [thread:$0]  %s2462_s4, 1024, %s74_s1, [#allocation9], %s2085_s19, %s2085_s19, %s2086_s20  }
  0x77   :  { %s2095_s12 = smov [#allocation13]   ;;  %s2096_s10 = smov [#allocation16]  }
  0x78   :  { %s97_s13 = sshll.u32 %s2095_s12, 4  ;;  %s120_s14 = sshll.u32 %s2096_s10, 4  ;;  %s98_s13 = int_to_ptr.vmem [resolvable:$true] %s97_s13  ;;  %s121_s14 = int_to_ptr.vmem [resolvable:$true] %s120_s14 }
  0x79   :  { %s2006_s26 = scalar_lea.hbm %s2464_s6, 1024 }
  0x7a   :  { %p2007_p0 = scmp.ne.s32.totalorder %s2464_s6, %s2006_s26  ;;  %p2010_p1 = scmp.lt.u32.totalorder %s2006_s26, %s2464_s6 }
  0x7c   :  { %p2012_p2 = pnand %p2010_p1, %p2007_p0 }
  0x7e   :  { %2015 = shalt.err (!%p2012_p2)
}
  0x7f   :  { %s2016_s4 = scalar_lea.vmem %s98_s13, 1024  ;;  %p2021_p4 = scmp.lt.s32.totalorder %s98_s13, %s98_s13 }
  0x80   :  { %p2017_p3 = scmp.ne.s32.totalorder %s98_s13, %s2016_s4  ;;  %p2022_p5 = scmp.lt.s32.totalorder %s2016_s4, %s2016_s4 }
  0x82   :  { %p2023_p6 = por %p2022_p5, %p2021_p4 }
  0x84   :  { %p2024_p7 = pnand %p2023_p6, %p2017_p3 }
  0x86   :  { %2027 = shalt.err (!%p2024_p7)
}
  0x87   :  { %103 = dma.hbm_to_vmem [thread:$0]  %s2464_s6, 1024, %s98_s13, [#allocation12], %s2085_s19, %s2085_s19, %s2086_s20  }
  0x88   :  { %s2028_s23 = scalar_lea.hbm %s2466_s8, 16 }
  0x89   :  { %p2029_p8 = scmp.ne.s32.totalorder %s2466_s8, %s2028_s23  ;;  %p2032_p9 = scmp.lt.u32.totalorder %s2028_s23, %s2466_s8 }
  0x8b   :  { %p2034_p10 = pnand %p2032_p9, %p2029_p8 }
  0x8d   :  { %2037 = shalt.err (!%p2034_p10)
}
  0x8e   :  { %s2038_s29 = scalar_lea.vmem %s121_s14, 16  ;;  %s2042_s2 = scalar_lea.vmem %s121_s14, 32 }
  0x8f   :  { %p2039_p11 = scmp.ne.s32.totalorder %s121_s14, %s2038_s29  ;;  %p2043_p12 = scmp.lt.s32.totalorder %s121_s14, %s121_s14 }
  0x90   :  { %p2044_p13 = scmp.lt.s32.totalorder %s2042_s2, %s2038_s29 }
  0x92   :  { %p2045_p0 = por %p2044_p13, %p2043_p12 }
  0x94   :  { %p2046_p1 = pnand %p2045_p0, %p2039_p11 }
  0x96   :  { %2049 = shalt.err (!%p2046_p1)
}
  0x97   :  { %123 = dma.hbm_to_vmem [thread:$0]  %s2466_s8, 16, %s121_s14, [#allocation15]  }
  0x98   :  { %2072 = dma.done.wait [#allocation3], 256  }
  0x99   :  { %2073 = vsyncadd [#allocation3], 4294967040 }
  0x9a   :  { %2074 = dma.done.wait [#allocation6], 4096  }
  0x9b   :  { %2075 = vsyncadd [#allocation6], 4294963200 }
  0x9c   :  { %2076 = dma.done.wait [#allocation9], 2048  }
  0x9d   :  { %2077 = vsyncadd [#allocation9], 4294965248 }
  0x9e   :  { %2078 = dma.done.wait [#allocation12], 2048  }
  0x9f   :  { %2079 = vsyncadd [#allocation12], 4294965248 }
  0xa0   :  { %2080 = dma.done.wait [#allocation15], 144  }
  0xa1   :  { %2081 = vsyncadd [#allocation15], 4294967152  ;;  %v2097_v0 = vmov 0.0   ;;  %vm2098_vm0 = vmmov 0   ;;  %v1776_v1 = vld [vmem:[#allocation10] sm:$0xff]   ;;  %v1777_v2 = vld [vmem:[#allocation10 + $0x8] sm:$0xff]   ;;  %v172_v60 = vlaneseq }
  0xa2   :  { %1544 = vmatprep.subr.bf16.mxu0 %v2097_v0  ;;  %1560 = vmatprep.mubr.msk.bf16.mxu0 %vm2098_vm0, %v2097_v0  ;;  %v1778_v3 = vld [vmem:[#allocation10 + $0x10] sm:$0xff]   ;;  %v1779_v4 = vld [vmem:[#allocation10 + $0x18] sm:$0xff]   ;;  %v1784_v5 = vld [vmem:[#allocation5] sm:$0xff]   ;;  %s2099_s8 = smov [#allocation17]  }
  0xa3   :  { %1564 = vmatprep.subr.bf16.mxu1 %v1776_v1  ;;  %1580 = vmatprep.mubr.bf16.mxu1 %v1784_v5  ;;  %v1780_v6 = vld [vmem:[#allocation10 + $0x20] sm:$0xff]   ;;  %v1781_v7 = vld [vmem:[#allocation10 + $0x28] sm:$0xff]   ;;  %v1782_v9 = vld [vmem:[#allocation10 + $0x30] sm:$0xff]   ;;  %v2301_v61 = vshrl.u32 %v172_v60, 7  ;;  %s1361_s20 = sshll.u32 %s2099_s8, 4  ;;  %s1362_s20 = int_to_ptr.vmem [resolvable:$true] %s1361_s20 }
  0xa4   :  { %1565 = vmatpush3.bf16.msra.mxu1 %v1776_v1  ;;  %v1794_v8 = vld [vmem:[#allocation8] sm:$0xff]   ;;  %v1795_v10 = vld [vmem:[#allocation8 + $0x8] sm:$0xff]   ;;  %v1783_v11 = vld [vmem:[#allocation10 + $0x38] sm:$0xff]   ;;  %s2050_s11 = scalar_lea.vmem %s1362_s20, 256  ;;  %p2055_p3 = scmp.lt.s32.totalorder %s1362_s20, %s1362_s20 }
  0xa5   :  { %1566 = vmatprep.subr.bf16.mxu1 %v1777_v2  ;;  %1545 = vmatpush3.bf16.msra.mxu0 %v1794_v8  ;;  %v1796_v12 = vld [vmem:[#allocation8 + $0x10] sm:$0xff]   ;;  %v1798_v13 = vld [vmem:[#allocation8 + $0x18] sm:$0xff]   ;;  %v1785_v14 = vld [vmem:[#allocation5 + $0x8] sm:$0xff]   ;;  %v315_v62 = vsub.s32 1, %v2301_v61  ;;  %p2051_p2 = scmp.ne.s32.totalorder %s1362_s20, %s2050_s11  ;;  %p2056_p4 = scmp.lt.s32.totalorder %s2050_s11, %s2050_s11 }
  0xa6   :  { %1546 = vmatprep.subr.bf16.mxu0 %v2097_v0  ;;  %v1786_v15 = vld [vmem:[#allocation5 + $0x10] sm:$0xff]   ;;  %v1800_v16 = vld [vmem:[#allocation8 + $0x20] sm:$0xff]   ;;  %v1801_v17 = vld [vmem:[#allocation8 + $0x28] sm:$0xff]  }
  0xa7   :  { %v1787_v18 = vld [vmem:[#allocation5 + $0x18] sm:$0xff]   ;;  %v1788_v19 = vld [vmem:[#allocation5 + $0x20] sm:$0xff]   ;;  %v1802_v20 = vld [vmem:[#allocation8 + $0x30] sm:$0xff]   ;;  %p2057_p5 = por %p2056_p4, %p2055_p3 }
  0xa8   :  { %1567 = vmatpush3.bf16.msra.mxu1 %v1777_v2  ;;  %v1804_v21 = vld [vmem:[#allocation8 + $0x38] sm:$0xff]   ;;  %v2289_v22 = vld [vmem:[#allocation2] sm:$0xff]  ;;  %v1789_v24 = vld [vmem:[#allocation5 + $0x28] sm:$0xff]  }
  0xa9   :  { %1568 = vmatprep.subr.bf16.mxu1 %v1778_v3  ;;  %1547 = vmatpush3.bf16.msra.mxu0 %v1795_v10  ;;  %v2291_v23 = vld [vmem:[#allocation2 + $0x8] sm:$0xff]  ;;  %v1790_v25 = vld [vmem:[#allocation5 + $0x30] sm:$0xff]   ;;  %v1792_v28 = vld [vmem:[#allocation5 + $0x40] sm:$0xff]   ;;  %p2058_p6 = pnand %p2057_p5, %p2051_p2 }
  0xaa   :  { %1548 = vmatprep.subr.bf16.mxu0 %v2097_v0  ;;  %v154_v26 = vpack.c.bf16 %v2291_v23, %v2289_v22  ;;  %v1791_v27 = vld [vmem:[#allocation5 + $0x38] sm:$0xff]   ;;  %v1793_v29 = vld [vmem:[#allocation5 + $0x48] sm:$0xff]   ;;  %v1797_v30 = vld [vmem:[#allocation5 + $0x50] sm:$0xff]  }
  0xab   :  { %v1799_v31 = vld [vmem:[#allocation5 + $0x58] sm:$0xff]   ;;  %v1803_v32 = vld [vmem:[#allocation5 + $0x60] sm:$0xff]   ;;  %v1805_v33 = vld [vmem:[#allocation5 + $0x68] sm:$0xff]  }
  0xac   :  { %1569 = vmatpush3.bf16.msra.mxu1 %v1778_v3  ;;  %v1806_v34 = vld [vmem:[#allocation5 + $0x70] sm:$0xff]   ;;  %v1807_v35 = vld [vmem:[#allocation5 + $0x78] sm:$0xff]   ;;  %v1808_v36 = vld [vmem:[#allocation11] sm:$0xff]  }
  0xad   :  { %1570 = vmatprep.subr.bf16.mxu1 %v1779_v4  ;;  %1549 = vmatpush3.bf16.msra.mxu0 %v1796_v12  ;;  %v1809_v37 = vld [vmem:[#allocation11 + $0x8] sm:$0xff]   ;;  %v1810_v38 = vld [vmem:[#allocation11 + $0x10] sm:$0xff]   ;;  %v1811_v39 = vld [vmem:[#allocation11 + $0x18] sm:$0xff]  }
  0xae   :  { %1550 = vmatprep.subr.bf16.mxu0 %v2097_v0  ;;  %v1812_v40 = vld [vmem:[#allocation11 + $0x20] sm:$0xff]   ;;  %v1813_v41 = vld [vmem:[#allocation11 + $0x28] sm:$0xff]   ;;  %v1814_v42 = vld [vmem:[#allocation11 + $0x30] sm:$0xff]  }
  0xaf   :  { %v1815_v43 = vld [vmem:[#allocation11 + $0x38] sm:$0xff]   ;;  %v1816_v44 = vld [vmem:[#allocation7] sm:$0xff]   ;;  %v1817_v45 = vld [vmem:[#allocation7 + $0x8] sm:$0xff]  }
  0xb0   :  { %1571 = vmatpush3.bf16.msra.mxu1 %v1779_v4  ;;  %v1818_v46 = vld [vmem:[#allocation7 + $0x10] sm:$0xff]   ;;  %v1819_v47 = vld [vmem:[#allocation7 + $0x18] sm:$0xff]   ;;  %v1820_v48 = vld [vmem:[#allocation7 + $0x20] sm:$0xff]  }
  0xb1   :  { %1572 = vmatprep.subr.bf16.mxu1 %v1780_v6  ;;  %1551 = vmatpush3.bf16.msra.mxu0 %v1798_v13  ;;  %v1821_v49 = vld [vmem:[#allocation7 + $0x28] sm:$0xff]   ;;  %v1822_v50 = vld [vmem:[#allocation7 + $0x30] sm:$0xff]   ;;  %v1823_v51 = vld [vmem:[#allocation7 + $0x38] sm:$0xff]  }
  0xb2   :  { %1552 = vmatprep.subr.bf16.mxu0 %v2097_v0  ;;  %v1824_v52 = vld [vmem:[#allocation7 + $0x40] sm:$0xff]   ;;  %v1825_v53 = vld [vmem:[#allocation7 + $0x48] sm:$0xff]   ;;  %v1826_v54 = vld [vmem:[#allocation7 + $0x50] sm:$0xff]  }
  0xb3   :  { %v1827_v55 = vld [vmem:[#allocation7 + $0x58] sm:$0xff]   ;;  %v1828_v56 = vld [vmem:[#allocation7 + $0x60] sm:$0xff]   ;;  %v1829_v57 = vld [vmem:[#allocation7 + $0x68] sm:$0xff]  }
  0xb4   :  { %1573 = vmatpush3.bf16.msra.mxu1 %v1780_v6  ;;  %v1830_v58 = vld [vmem:[#allocation7 + $0x70] sm:$0xff]   ;;  %v1831_v59 = vld [vmem:[#allocation7 + $0x78] sm:$0xff]   ;;  %v2304_v63 = vld [vmem:[#allocation14] sm:$0xff] }
  0xb5   :  { %1574 = vmatprep.subr.bf16.mxu1 %v1781_v7  ;;  %1553 = vmatpush3.bf16.msra.mxu0 %v1800_v16  ;;  %v2307_v1 = vrot.slane %v2304_v63, %v315_v62 }
  0xb6   :  { %1554 = vmatprep.subr.bf16.mxu0 %v2097_v0 }
  0xb8   :  { %1575 = vmatpush3.bf16.msra.mxu1 %v1781_v7 }
  0xb9   :  { %1576 = vmatprep.subr.bf16.mxu1 %v1782_v9  ;;  %1555 = vmatpush3.bf16.msra.mxu0 %v1801_v17 }
  0xba   :  { %1556 = vmatprep.subr.bf16.mxu0 %v2097_v0 }
  0xbc   :  { %1577 = vmatpush3.bf16.msra.mxu1 %v1782_v9 }
  0xbd   :  { %1578 = vmatprep.subr.bf16.mxu1 %v1783_v11  ;;  %1557 = vmatpush3.bf16.msra.mxu0 %v1802_v20 }
  0xbe   :  { %1558 = vmatprep.subr.bf16.mxu0 %v2097_v0 }
  0xc0   :  { %1579 = vmatpush3.bf16.msra.mxu1 %v1783_v11 }
  0xc1   :  { %1660 = vmatprep.subr.bf16.mxu1 %v2097_v0  ;;  %1559 = vmatpush3.bf16.msra.mxu0 %v1804_v21 }
  0xc2   :  { %1612 = vmatprep.subr.bf16.mxu0 %v1808_v36 }
  0xc3   :  { %1581 = vmatmul.mubr.bf16.vlgmr.msra.gmra.mrb[0].mxu1 %v1785_v14 }
  0xc4   :  { %1584 = vmatprep.mubr.bf16.mxu1 %v1786_v15  ;;  %1561 = vmatmul.mubr.bf16.vlgmr.msra.gmra.mrb[0].mxu0 %v154_v26 }
  0xc5   :  { %1613 = vmatpush3.bf16.msra.mxu0 %v1808_v36  ;;  %1628 = vmatprep.mubr.bf16.mxu0 %v1816_v44 }
  0xc6   :  { %1614 = vmatprep.subr.bf16.mxu0 %v1809_v37 }
  0xc9   :  { %1615 = vmatpush3.bf16.msra.mxu0 %v1809_v37 }
  0xca   :  { %1616 = vmatprep.subr.bf16.mxu0 %v1810_v38 }
  0xcb   :  { %1585 = vmatmul.mubr.bf16.gmra.mrb[4].mxu1 %v1787_v18 }
  0xcc   :  { %1588 = vmatprep.mubr.bf16.mxu1 %v1788_v19 }
  0xcd   :  { %1617 = vmatpush3.bf16.msra.mxu0 %v1810_v38 }
  0xce   :  { %1618 = vmatprep.subr.bf16.mxu0 %v1811_v39 }
  0xd1   :  { %1619 = vmatpush3.bf16.msra.mxu0 %v1811_v39 }
  0xd2   :  { %1620 = vmatprep.subr.bf16.mxu0 %v1812_v40 }
  0xd3   :  { %1589 = vmatmul.mubr.bf16.gmra.mrb[8].mxu1 %v1789_v24 }
  0xd4   :  { %1592 = vmatprep.mubr.bf16.mxu1 %v1790_v25 }
  0xd5   :  { %1621 = vmatpush3.bf16.msra.mxu0 %v1812_v40 }
  0xd6   :  { %1622 = vmatprep.subr.bf16.mxu0 %v1813_v41 }
  0xd9   :  { %1623 = vmatpush3.bf16.msra.mxu0 %v1813_v41 }
  0xda   :  { %1624 = vmatprep.subr.bf16.mxu0 %v1814_v42 }
  0xdb   :  { %1593 = vmatmul.mubr.bf16.gmra.mrb[12].mxu1 %v1791_v27 }
  0xdc   :  { %1596 = vmatprep.mubr.bf16.mxu1 %v1792_v28 }
  0xdd   :  { %1625 = vmatpush3.bf16.msra.mxu0 %v1814_v42 }
  0xde   :  { %1626 = vmatprep.subr.bf16.mxu0 %v1815_v43 }
  0xe1   :  { %1627 = vmatpush3.bf16.msra.mxu0 %v1815_v43 }
  0xe2   :  { %1680 = vmatprep.subr.bf16.mxu0 %v2097_v0 }
  0xe3   :  { %1597 = vmatmul.mubr.bf16.gmra.mrb[16].mxu1 %v1793_v29 }
  0xe4   :  { %1600 = vmatprep.mubr.bf16.mxu1 %v1797_v30  ;;  %1629 = vmatmul.mubr.bf16.vlgmr.msra.gmra.mrb[4].mxu0 %v1817_v45 }
  0xe5   :  { %1632 = vmatprep.mubr.bf16.mxu0 %v1818_v46 }
  0xeb   :  { %1601 = vmatmul.mubr.bf16.gmra.mrb[20].mxu1 %v1799_v31 }
  0xec   :  { %1604 = vmatprep.mubr.bf16.mxu1 %v1803_v32  ;;  %1633 = vmatmul.mubr.bf16.gmra.mrb[8].mxu0 %v1819_v47 }
  0xed   :  { %1636 = vmatprep.mubr.bf16.mxu0 %v1820_v48 }
  0xf3   :  { %1605 = vmatmul.mubr.bf16.gmra.mrb[24].mxu1 %v1805_v33 }
  0xf4   :  { %1608 = vmatprep.mubr.bf16.mxu1 %v1806_v34  ;;  %1637 = vmatmul.mubr.bf16.gmra.mrb[12].mxu0 %v1821_v49 }
  0xf5   :  { %1640 = vmatprep.mubr.bf16.mxu0 %v1822_v50 }
  0xfb   :  { %1609 = vmatmul.mubr.bf16.gmra.mrb[28].mxu1 %v1807_v35 }
  0xfc   :  { %1676 = vmatprep.mubr.msk.bf16.mxu1 %vm2098_vm0, %v2097_v0  ;;  %1641 = vmatmul.mubr.bf16.gmra.mrb[16].mxu0 %v1823_v51 }
  0xfd   :  { %1644 = vmatprep.mubr.bf16.mxu0 %v1824_v52 }
 0x104   :  { %1645 = vmatmul.mubr.bf16.gmra.mrb[20].mxu0 %v1825_v53 }
 0x105   :  { %1648 = vmatprep.mubr.bf16.mxu0 %v1826_v54 }
 0x10c   :  { %1649 = vmatmul.mubr.bf16.gmra.mrb[24].mxu0 %v1827_v55 }
 0x10d   :  { %1652 = vmatprep.mubr.bf16.mxu0 %v1828_v56 }
 0x114   :  { %1653 = vmatmul.mubr.bf16.gmra.mrb[28].mxu0 %v1829_v57 }
 0x115   :  { %1656 = vmatprep.mubr.bf16.mxu0 %v1830_v58 }
 0x11c   :  { %1657 = vmatmul.mubr.bf16.gmra.mrb[32].mxu0 %v1831_v59 }
 0x11d   :  { %1696 = vmatprep.mubr.msk.bf16.mxu0 %vm2098_vm0, %v2097_v0 }
 0x196   :  { %v1582_v2 = vpop.f32.mrb[0].mxu1 }
 0x197   :  { %v495_v3 = vpop.f32.mrb[1].mxu1  ;;  %v504_v5 = vadd.f32 %v1582_v2, %v2307_v1  ;;  %v2319_v26 = vpop.f32.mrb[0].mxu0 }
 0x198   :  { %v1583_v4 = vpop.f32.mrb[2].mxu1  ;;  %v496_v8 = vadd.f32 %v495_v3, %v2307_v1  ;;  %v1562_v28 = vpop.f32.mrb[1].mxu0 }
 0x199   :  { %v507_v6 = vadd.f32 %v1583_v4, %v2307_v1  ;;  %v498_v7 = vpop.f32.mrb[3].mxu1  ;;  %v2323_v32 = vpop.f32.mrb[2].mxu0 }
 0x19a   :  { %v499_v9 = vadd.f32 %v498_v7, %v2307_v1  ;;  %v1563_v35 = vpop.f32.mrb[3].mxu0 }
 0x19b   :  { %v984_v10 = vpack.c.bf16 %v507_v6, %v504_v5 }
 0x19c   :  { %v983_v11 = vpack.c.bf16 %v499_v9, %v496_v8 }
 0x19e   :  { %v1586_v12 = vpop.f32.mrb[4].mxu1  ;;  %1661 = vmatpush3.bf16.xpose.msra.mxu1 %v983_v11 }
 0x19f   :  { %v511_v13 = vpop.f32.mrb[5].mxu1  ;;  %1662 = vmatprep.subr.bf16.mxu1 %v2097_v0  ;;  %v520_v15 = vadd.f32 %v1586_v12, %v2307_v1 }
 0x1a0   :  { %v1587_v14 = vpop.f32.mrb[6].mxu1  ;;  %v512_v18 = vadd.f32 %v511_v13, %v2307_v1 }
 0x1a1   :  { %v523_v16 = vadd.f32 %v1587_v14, %v2307_v1  ;;  %v514_v17 = vpop.f32.mrb[7].mxu1  ;;  %v174_v14 = vsub.s32 0, %v2301_v61 }
 0x1a2   :  { %v515_v19 = vadd.f32 %v514_v17, %v2307_v1 }
 0x1a3   :  { %v986_v20 = vpack.c.bf16 %v523_v16, %v520_v15 }
 0x1a4   :  { %v985_v21 = vpack.c.bf16 %v515_v19, %v512_v18  ;;  %v175_v19 = vrot.slane %v2304_v63, %v174_v14 }
 0x1a6   :  { %v1590_v24 = vpop.f32.mrb[8].mxu1  ;;  %1663 = vmatpush3.bf16.xpose.msra.mxu1 %v984_v10  ;;  %v259_v28 = vadd.f32 %v2319_v26, %v175_v19 }
 0x1a7   :  { %v527_v25 = vpop.f32.mrb[9].mxu1  ;;  %1664 = vmatprep.subr.bf16.mxu1 %v2097_v0  ;;  %v536_v29 = vadd.f32 %v1590_v24, %v2307_v1 }
 0x1a8   :  { %v1591_v27 = vpop.f32.mrb[10].mxu1  ;;  %v528_v33 = vadd.f32 %v527_v25, %v2307_v1  ;;  %v979_v35 = vmul.f32 0.16903085, %v259_v28 }
 0x1a9   :  { %v539_v30 = vadd.f32 %v1591_v27, %v2307_v1  ;;  %v530_v31 = vpop.f32.mrb[11].mxu1 }
 0x1aa   :  { %v531_v34 = vadd.f32 %v530_v31, %v2307_v1 }
 0x1ab   :  { %v988_v36 = vpack.c.bf16 %v539_v30, %v536_v29 }
 0x1ac   :  { %v987_v37 = vpack.c.bf16 %v531_v34, %v528_v33 }
 0x1ae   :  { %v1594_v38 = vpop.f32.mrb[12].mxu1  ;;  %1665 = vmatpush3.bf16.xpose.msra.mxu1 %v985_v21 }
 0x1af   :  { %v543_v39 = vpop.f32.mrb[13].mxu1  ;;  %1666 = vmatprep.subr.bf16.mxu1 %v2097_v0  ;;  %v2329_v41 = vadd.f32 %v1594_v38, %v2307_v1  ;;  %v672_v38 = vsub.s32 2, %v2301_v61 }
 0x1b0   :  { %v1595_v40 = vpop.f32.mrb[14].mxu1  ;;  %v544_v44 = vadd.f32 %v543_v39, %v2307_v1 }
 0x1b1   :  { %v2332_v42 = vadd.f32 %v1595_v40, %v2307_v1  ;;  %v546_v43 = vpop.f32.mrb[15].mxu1  ;;  %v2377_v39 = vrot.slane %v2304_v63, %v672_v38 }
 0x1b2   :  { %v547_v45 = vadd.f32 %v546_v43, %v2307_v1 }
 0x1b3   :  { %v990_v46 = vpack.c.bf16 %v2332_v42, %v2329_v41 }
 0x1b4   :  { %v989_v47 = vpack.c.bf16 %v547_v45, %v544_v44 }
 0x1b6   :  { %v1598_v48 = vpop.f32.mrb[16].mxu1  ;;  %1667 = vmatpush3.bf16.xpose.msra.mxu1 %v986_v20 }
 0x1b7   :  { %v559_v49 = vpop.f32.mrb[17].mxu1  ;;  %1668 = vmatprep.subr.bf16.mxu1 %v2097_v0  ;;  %v568_v51 = vadd.f32 %v1598_v48, %v2307_v1  ;;  %v1630_v40 = vpop.f32.mrb[4].mxu0 }
 0x1b8   :  { %v1599_v50 = vpop.f32.mrb[18].mxu1  ;;  %v560_v54 = vadd.f32 %v559_v49, %v2307_v1  ;;  %v861_v41 = vadd.f32 %v1630_v40, %v2377_v39  ;;  %v852_v42 = vpop.f32.mrb[5].mxu0 }
 0x1b9   :  { %v571_v52 = vadd.f32 %v1599_v50, %v2307_v1  ;;  %v562_v53 = vpop.f32.mrb[19].mxu1  ;;  %v1631_v43 = vpop.f32.mrb[6].mxu0 }
 0x1ba   :  { %v563_v55 = vadd.f32 %v562_v53, %v2307_v1  ;;  %v864_v44 = vadd.f32 %v1631_v43, %v2377_v39  ;;  %v855_v45 = vpop.f32.mrb[7].mxu0 }
 0x1bb   :  { %v992_v56 = vpack.c.bf16 %v571_v52, %v568_v51 }
 0x1bc   :  { %v991_v57 = vpack.c.bf16 %v563_v55, %v560_v54 }
 0x1be   :  { %1669 = vmatpush3.bf16.xpose.msra.mxu1 %v987_v37  ;;  %1681 = vmatpush3.bf16.xpose.msra.mxu0 %v991_v57  ;;  %v1602_v58 = vpop.f32.mrb[20].mxu1 }
 0x1bf   :  { %v584_v59 = vadd.f32 %v1602_v58, %v2307_v1  ;;  %v575_v60 = vpop.f32.mrb[21].mxu1  ;;  %1670 = vmatprep.subr.bf16.mxu1 %v2097_v0  ;;  %1682 = vmatprep.subr.bf16.mxu0 %v2097_v0  ;;  %v1634_v49 = vpop.f32.mrb[8].mxu0 }
 0x1c0   :  { %v576_v62 = vadd.f32 %v575_v60, %v2307_v1  ;;  %v1603_v2 = vpop.f32.mrb[22].mxu1  ;;  %v877_v50 = vadd.f32 %v1634_v49, %v2377_v39  ;;  %v868_v51 = vpop.f32.mrb[9].mxu0 }
 0x1c1   :  { %v587_v3 = vadd.f32 %v1603_v2, %v2307_v1  ;;  %v578_v4 = vpop.f32.mrb[23].mxu1  ;;  %v869_v52 = vadd.f32 %v868_v51, %v2377_v39  ;;  %v1635_v53 = vpop.f32.mrb[10].mxu0 }
 0x1c2   :  { %v579_v5 = vadd.f32 %v578_v4, %v2307_v1  ;;  %v880_v54 = vadd.f32 %v1635_v53, %v2377_v39  ;;  %v871_v55 = vpop.f32.mrb[11].mxu0 }
 0x1c3   :  { %v994_v6 = vpack.c.bf16 %v587_v3, %v584_v59 }
 0x1c4   :  { %v993_v7 = vpack.c.bf16 %v579_v5, %v576_v62  ;;  %v1109_v57 = vpack.c.bf16 %v880_v54, %v877_v50 }
 0x1c6   :  { %1671 = vmatpush3.bf16.xpose.msra.mxu1 %v988_v36  ;;  %1683 = vmatpush3.bf16.xpose.msra.mxu0 %v992_v56  ;;  %v1606_v8 = vpop.f32.mrb[24].mxu1  ;;  %v981_v36 = vpack.c.bf16 %v979_v35, %v979_v35  ;;  %v872_v56 = vadd.f32 %v871_v55, %v2377_v39 }
 0x1c7   :  { %1672 = vmatprep.subr.bf16.mxu1 %v2097_v0  ;;  %1684 = vmatprep.subr.bf16.mxu0 %v2097_v0  ;;  %v600_v9 = vadd.f32 %v1606_v8, %v2307_v1  ;;  %v591_v10 = vpop.f32.mrb[25].mxu1  ;;  %v1638_v59 = vpop.f32.mrb[12].mxu0 }
 0x1c8   :  { %v592_v11 = vadd.f32 %v591_v10, %v2307_v1  ;;  %v1607_v12 = vpop.f32.mrb[26].mxu1  ;;  %v1108_v58 = vpack.c.bf16 %v872_v56, %v869_v52  ;;  %v893_v60 = vadd.f32 %v1638_v59, %v2377_v39  ;;  %v884_v62 = vpop.f32.mrb[13].mxu0 }
 0x1c9   :  { %v603_v13 = vadd.f32 %v1607_v12, %v2307_v1  ;;  %v594_v15 = vpop.f32.mrb[27].mxu1  ;;  %v885_v2 = vadd.f32 %v884_v62, %v2377_v39  ;;  %v1639_v3 = vpop.f32.mrb[14].mxu0  ;;  %v1433_v62 = vld [vmem:[#allocation16] ss:$0 sm:$0xff] }
 0x1ca   :  { %v595_v16 = vadd.f32 %v594_v15, %v2307_v1  ;;  %v896_v4 = vadd.f32 %v1639_v3, %v2377_v39  ;;  %v887_v5 = vpop.f32.mrb[15].mxu0 }
 0x1cb   :  { %v996_v17 = vpack.c.bf16 %v603_v13, %v600_v9 }
 0x1cc   :  { %v995_v18 = vpack.c.bf16 %v595_v16, %v592_v11 }
 0x1ce   :  { %1673 = vmatpush3.bf16.xpose.msra.mxu1 %v989_v47  ;;  %1685 = vmatpush3.bf16.xpose.msra.mxu0 %v993_v7  ;;  %v1610_v20 = vpop.f32.mrb[28].mxu1  ;;  %v1107_v47 = vpack.c.bf16 %v864_v44, %v861_v41  ;;  %v1111_v7 = vpack.c.bf16 %v896_v4, %v893_v60 }
 0x1cf   :  { %1674 = vmatprep.subr.bf16.mxu1 %v2097_v0  ;;  %1686 = vmatprep.subr.bf16.mxu0 %v2097_v0  ;;  %v616_v21 = vadd.f32 %v1610_v20, %v2307_v1  ;;  %v607_v24 = vpop.f32.mrb[29].mxu1  ;;  %v1642_v9 = vpop.f32.mrb[16].mxu0 }
 0x1d0   :  { %v608_v25 = vadd.f32 %v607_v24, %v2307_v1  ;;  %v1611_v27 = vpop.f32.mrb[30].mxu1  ;;  %v909_v10 = vadd.f32 %v1642_v9, %v2377_v39  ;;  %v900_v11 = vpop.f32.mrb[17].mxu0 }
 0x1d1   :  { %v619_v29 = vadd.f32 %v1611_v27, %v2307_v1  ;;  %v610_v30 = vpop.f32.mrb[31].mxu1  ;;  %v901_v12 = vadd.f32 %v900_v11, %v2377_v39  ;;  %v1643_v13 = vpop.f32.mrb[18].mxu0 }
 0x1d2   :  { %v611_v31 = vadd.f32 %v610_v30, %v2307_v1  ;;  %v262_v1 = vadd.f32 %v2323_v32, %v175_v19  ;;  %v853_v32 = vadd.f32 %v852_v42, %v2377_v39  ;;  %v912_v14 = vadd.f32 %v1643_v13, %v2377_v39  ;;  %v903_v15 = vpop.f32.mrb[19].mxu0 }
 0x1d3   :  { %v998_v33 = vpack.c.bf16 %v619_v29, %v616_v21  ;;  %v904_v16 = vadd.f32 %v903_v15, %v2377_v39 }
 0x1d4   :  { %v997_v34 = vpack.c.bf16 %v611_v31, %v608_v25  ;;  %v980_v26 = vmul.f32 0.16903085, %v262_v1 }
 0x1d6   :  { %1675 = vmatpush3.bf16.xpose.msra.mxu1 %v990_v46  ;;  %1687 = vmatpush3.bf16.xpose.msra.mxu0 %v994_v6  ;;  %v982_v37 = vpack.c.bf16 %v980_v26, %v980_v26  ;;  %v856_v46 = vadd.f32 %v855_v45, %v2377_v39  ;;  %v888_v6 = vadd.f32 %v887_v5, %v2377_v39 }
 0x1d7   :  { %1688 = vmatprep.subr.bf16.mxu0 %v2097_v0  ;;  %1700 = vmatprep.subr.bf16.mxu1 %v2097_v0  ;;  %v1646_v19 = vpop.f32.mrb[20].mxu0 }
 0x1d8   :  { %v1106_v48 = vpack.c.bf16 %v856_v46, %v853_v32  ;;  %v1110_v8 = vpack.c.bf16 %v888_v6, %v885_v2  ;;  %v925_v20 = vadd.f32 %v1646_v19, %v2377_v39  ;;  %v916_v21 = vpop.f32.mrb[21].mxu0 }
 0x1d9   :  { %v917_v24 = vadd.f32 %v916_v21, %v2377_v39  ;;  %v1647_v25 = vpop.f32.mrb[22].mxu0 }
 0x1da   :  { %v928_v27 = vadd.f32 %v1647_v25, %v2377_v39  ;;  %v919_v28 = vpop.f32.mrb[23].mxu0 }
 0x1db   :  { %v920_v29 = vadd.f32 %v919_v28, %v2377_v39 }
 0x1dc   :  { %v1115_v30 = vpack.c.bf16 %v928_v27, %v925_v20 }
 0x1dd   :  { %1677 = vmatmul.mubr.bf16.vlgmr.msra.gmra.mrb[32].mxu1 %v981_v36  ;;  %v1114_v31 = vpack.c.bf16 %v920_v29, %v917_v24 }
 0x1de   :  { %1689 = vmatpush3.bf16.xpose.msra.mxu0 %v995_v18  ;;  %1716 = vmatprep.mubr.msk.bf16.mxu1 %vm2098_vm0, %v2097_v0  ;;  %v1112_v18 = vpack.c.bf16 %v904_v16, %v901_v12 }
 0x1df   :  { %1690 = vmatprep.subr.bf16.mxu0 %v2097_v0  ;;  %1701 = vmatpush3.bf16.msra.mxu1 %v1106_v48 }
 0x1e0   :  { %1702 = vmatprep.subr.bf16.mxu1 %v2097_v0 }
 0x1e3   :  { %1703 = vmatpush3.bf16.msra.mxu1 %v1107_v47 }
 0x1e4   :  { %1704 = vmatprep.subr.bf16.mxu1 %v2097_v0 }
 0x1e6   :  { %1691 = vmatpush3.bf16.xpose.msra.mxu0 %v996_v17  ;;  %v1113_v17 = vpack.c.bf16 %v912_v14, %v909_v10 }
 0x1e7   :  { %1692 = vmatprep.subr.bf16.mxu0 %v2097_v0  ;;  %1705 = vmatpush3.bf16.msra.mxu1 %v1108_v58 }
 0x1e8   :  { %1706 = vmatprep.subr.bf16.mxu1 %v2097_v0 }
 0x1eb   :  { %1707 = vmatpush3.bf16.msra.mxu1 %v1109_v57 }
 0x1ec   :  { %1708 = vmatprep.subr.bf16.mxu1 %v2097_v0 }
 0x1ee   :  { %1693 = vmatpush3.bf16.xpose.msra.mxu0 %v997_v34 }
 0x1ef   :  { %1694 = vmatprep.subr.bf16.mxu0 %v2097_v0  ;;  %1709 = vmatpush3.bf16.msra.mxu1 %v1110_v8 }
 0x1f0   :  { %1710 = vmatprep.subr.bf16.mxu1 %v2097_v0 }
 0x1f3   :  { %1711 = vmatpush3.bf16.msra.mxu1 %v1111_v7 }
 0x1f4   :  { %1712 = vmatprep.subr.bf16.mxu1 %v2097_v0 }
 0x1f6   :  { %1695 = vmatpush3.bf16.xpose.msra.mxu0 %v998_v33  ;;  %v1650_v33 = vpop.f32.mrb[24].mxu0 }
 0x1f7   :  { %1720 = vmatprep.subr.bf16.mxu0 %v2097_v0  ;;  %1713 = vmatpush3.bf16.msra.mxu1 %v1112_v18  ;;  %v941_v34 = vadd.f32 %v1650_v33, %v2377_v39  ;;  %v932_v35 = vpop.f32.mrb[25].mxu0  ;;  %v1834_v33 = vld [vmem:[#allocation13 + $0x10] sm:$0xff]  }
 0x1f8   :  { %1714 = vmatprep.subr.bf16.mxu1 %v2097_v0  ;;  %v933_v36 = vadd.f32 %v932_v35, %v2377_v39  ;;  %v1651_v1 = vpop.f32.mrb[26].mxu0  ;;  %v1836_v35 = vld [vmem:[#allocation13 + $0x20] sm:$0xff]  }
 0x1f9   :  { %v944_v26 = vadd.f32 %v1651_v1, %v2377_v39  ;;  %v1838_v1 = vld [vmem:[#allocation13 + $0x30] sm:$0xff]  }
 0x1fb   :  { %1715 = vmatpush3.bf16.msra.mxu1 %v1113_v17  ;;  %v1117_v40 = vpack.c.bf16 %v944_v26, %v941_v34  ;;  %v1835_v34 = vld [vmem:[#allocation13 + $0x18] sm:$0xff]  }
 0x1fc   :  { %1740 = vmatprep.subr.bf16.mxu1 %v2097_v0  ;;  %v1839_v26 = vld [vmem:[#allocation13 + $0x38] sm:$0xff]  }
 0x1fd   :  { %1697 = vmatmul.mubr.bf16.vlgmr.msra.gmra.mrb[36].mxu0 %v982_v37  ;;  %v935_v37 = vpop.f32.mrb[27].mxu0 }
 0x1fe   :  { %1736 = vmatprep.mubr.msk.bf16.mxu0 %vm2098_vm0, %v2097_v0  ;;  %1721 = vmatpush3.bf16.msra.mxu0 %v1114_v31  ;;  %v936_v38 = vadd.f32 %v935_v37, %v2377_v39  ;;  %v1654_v42 = vpop.f32.mrb[28].mxu0  ;;  %v1833_v31 = vld [vmem:[#allocation13 + $0x8] sm:$0xff]  }
 0x1ff   :  { %1722 = vmatprep.subr.bf16.mxu0 %v2097_v0  ;;  %v957_v32 = vadd.f32 %v1654_v42, %v2377_v39  ;;  %v948_v43 = vpop.f32.mrb[29].mxu0 }
 0x200   :  { %v1116_v41 = vpack.c.bf16 %v936_v38, %v933_v36  ;;  %v949_v44 = vadd.f32 %v948_v43, %v2377_v39  ;;  %v1655_v45 = vpop.f32.mrb[30].mxu0  ;;  %v1837_v36 = vld [vmem:[#allocation13 + $0x28] sm:$0xff]  }
 0x201   :  { %v960_v46 = vadd.f32 %v1655_v45, %v2377_v39  ;;  %v951_v47 = vpop.f32.mrb[31].mxu0 }
 0x202   :  { %1723 = vmatpush3.bf16.msra.mxu0 %v1115_v30  ;;  %v952_v48 = vadd.f32 %v951_v47, %v2377_v39  ;;  %v1658_v51 = vpop.f32.mrb[32].mxu0  ;;  %v1832_v30 = vld [vmem:[#allocation13] sm:$0xff]  }
 0x203   :  { %1724 = vmatprep.subr.bf16.mxu0 %v2097_v0  ;;  %v1119_v49 = vpack.c.bf16 %v960_v46, %v957_v32  ;;  %v973_v52 = vadd.f32 %v1658_v51, %v2377_v39  ;;  %v964_v53 = vpop.f32.mrb[33].mxu0  ;;  %v1221_v46 = vsub.s32 3, %v2301_v61 }
 0x204   :  { %v1118_v50 = vpack.c.bf16 %v952_v48, %v949_v44  ;;  %v965_v54 = vadd.f32 %v964_v53, %v2377_v39  ;;  %v1659_v55 = vpop.f32.mrb[34].mxu0 }
 0x205   :  { %v976_v56 = vadd.f32 %v1659_v55, %v2377_v39  ;;  %v967_v57 = vpop.f32.mrb[35].mxu0  ;;  %v1222_v47 = vrot.slane %v2304_v63, %v1221_v46 }
 0x206   :  { %1725 = vmatpush3.bf16.msra.mxu0 %v1116_v41  ;;  %v968_v58 = vadd.f32 %v967_v57, %v2377_v39 }
 0x207   :  { %1726 = vmatprep.subr.bf16.mxu0 %v2097_v0  ;;  %v1121_v59 = vpack.c.bf16 %v976_v56, %v973_v52 }
 0x208   :  { %v1120_v60 = vpack.c.bf16 %v968_v58, %v965_v54 }
 0x20a   :  { %1727 = vmatpush3.bf16.msra.mxu0 %v1117_v40 }
 0x20b   :  { %1728 = vmatprep.subr.bf16.mxu0 %v2097_v0 }
 0x20e   :  { %1729 = vmatpush3.bf16.msra.mxu0 %v1118_v50 }
 0x20f   :  { %1730 = vmatprep.subr.bf16.mxu0 %v2097_v0 }
 0x212   :  { %1731 = vmatpush3.bf16.msra.mxu0 %v1119_v49 }
 0x213   :  { %1732 = vmatprep.subr.bf16.mxu0 %v2097_v0 }
 0x216   :  { %1733 = vmatpush3.bf16.msra.mxu0 %v1120_v60 }
 0x217   :  { %1734 = vmatprep.subr.bf16.mxu0 %v2097_v0 }
 0x21a   :  { %1735 = vmatpush3.bf16.msra.mxu0 %v1121_v59 }
 0x2b0   :  { %v1040_v2 = vpop.f32.mrb[32].mxu1 }
 0x2b1   :  { %v1041_v3 = vadd.f32 %v1433_v62, %v1040_v2  ;;  %v1678_v4 = vpop.f32.mrb[33].mxu1 }
 0x2b2   :  { %v1043_v5 = vpop.f32.mrb[34].mxu1 }
 0x2b3   :  { %1086 = vmax.xlane.f32.xlu0 %v1041_v3  ;;  %v1679_v6 = vpop.f32.mrb[35].mxu1 }
 0x2d0   :  { %v1080_v7 = vpop.f32.mrb[36].mxu0 }
 0x2d1   :  { %v1081_v8 = vadd.f32 %v1433_v62, %v1080_v7  ;;  %v1698_v9 = vpop.f32.mrb[37].mxu0 }
 0x2d2   :  { %v1083_v39 = vpop.f32.mrb[38].mxu0 }
 0x2d3   :  { %1088 = vmax.xlane.f32.xlu0 %v1081_v8  ;;  %v1699_v10 = vpop.f32.mrb[39].mxu0 }
 0x2d4   :  { %v1344_v10 = vsub.s32 4, %v2301_v61 }
 0x340   :  { %v1087_v11 = vpop.xlane.xlu0 %1086 }
 0x341   :  { %v1090_v12 = vsub.f32 %v1041_v3, %v1087_v11  ;;  %v1350_v11 = vsub.s32 5, %v2301_v61 }
 0x343   :  { %v1092_v13 = vmul.f32 1.442695, %v1090_v12 }
 0x345   :  { %1840 = vpow2.f32 %v1092_v13  ;;  %v1345_v13 = vrot.slane %v2304_v63, %v1344_v10 }
 0x34f   :  { %v1841_v14 = vpop.eup %1840 }
 0x350   :  { %1096 = vadd.xlane.f32.xlu1 %v1841_v14 }
 0x360   :  { %v1089_v15 = vpop.xlane.xlu0 %1088 }
 0x361   :  { %v1091_v16 = vsub.f32 %v1081_v8, %v1089_v15 }
 0x363   :  { %v1094_v17 = vmul.f32 1.442695, %v1091_v16 }
 0x365   :  { %1842 = vpow2.f32 %v1094_v17  ;;  %v1351_v17 = vrot.slane %v2304_v63, %v1350_v11 }
 0x36f   :  { %v1843_v18 = vpop.eup %1842 }
 0x370   :  { %1098 = vadd.xlane.f32.xlu1 %v1843_v18 }
 0x3dd   :  { %v1097_v19 = vpop.xlane.xlu1 %1096 }
 0x3de   :  { %1844 = vrcp.f32 %v1097_v19 }
 0x3e8   :  { %v1845_v20 = vpop.eup %1844 }
 0x3e9   :  { %v1102_v21 = vmul.f32 %v1845_v20, %v1841_v14 }
 0x3eb   :  { %v1104_v24 = vpack.c.bf16 %v1102_v21, %v1102_v21 }
 0x3ed   :  { %1717 = vmatmul.mubr.bf16.vlgmr.msra.gmra.mrb[36].mxu1 %v1104_v24 }
 0x3ee   :  { %1756 = vmatprep.mubr.msk.bf16.mxu1 %vm2098_vm0, %v2097_v0  ;;  %1741 = vmatpush3.bf16.msra.mxu1 %v1832_v30 }
 0x3ef   :  { %1742 = vmatprep.subr.bf16.mxu1 %v2097_v0 }
 0x3f2   :  { %1743 = vmatpush3.bf16.msra.mxu1 %v1833_v31 }
 0x3f3   :  { %1744 = vmatprep.subr.bf16.mxu1 %v2097_v0 }
 0x3f6   :  { %1745 = vmatpush3.bf16.msra.mxu1 %v1834_v33 }
 0x3f7   :  { %1746 = vmatprep.subr.bf16.mxu1 %v2097_v0 }
 0x3fa   :  { %1747 = vmatpush3.bf16.msra.mxu1 %v1835_v34 }
 0x3fb   :  { %1748 = vmatprep.subr.bf16.mxu1 %v2097_v0 }
 0x3fd   :  { %v1099_v25 = vpop.xlane.xlu1 %1098 }
 0x3fe   :  { %1846 = vrcp.f32 %v1099_v25  ;;  %1749 = vmatpush3.bf16.msra.mxu1 %v1836_v35 }
 0x3ff   :  { %1750 = vmatprep.subr.bf16.mxu1 %v2097_v0 }
 0x402   :  { %1751 = vmatpush3.bf16.msra.mxu1 %v1837_v36 }
 0x403   :  { %1752 = vmatprep.subr.bf16.mxu1 %v2097_v0 }
 0x406   :  { %1753 = vmatpush3.bf16.msra.mxu1 %v1838_v1 }
 0x407   :  { %1754 = vmatprep.subr.bf16.mxu1 %v2097_v0 }
 0x408   :  { %v1847_v27 = vpop.eup %1846 }
 0x409   :  { %v1103_v28 = vmul.f32 %v1847_v27, %v1843_v18 }
 0x40a   :  { %1755 = vmatpush3.bf16.msra.mxu1 %v1839_v26 }
 0x40b   :  { %v1105_v29 = vpack.c.bf16 %v1103_v28, %v1103_v28 }
 0x40d   :  { %1737 = vmatmul.mubr.bf16.vlgmr.msra.gmra.mrb[40].mxu0 %v1105_v29 }
 0x4c0   :  { %v1156_v37 = vpop.f32.mrb[36].mxu1 }
 0x4c1   :  { %v1718_v38 = vpop.f32.mrb[37].mxu1 }
 0x4c2   :  { %v1159_v40 = vpop.f32.mrb[38].mxu1 }
 0x4c3   :  { %v1719_v41 = vpop.f32.mrb[39].mxu1 }
 0x4e0   :  { %v1196_v42 = vpop.f32.mrb[40].mxu0 }
 0x4e1   :  { %v1202_v32 = vpack.c.bf16 %v1196_v42, %v1156_v37  ;;  %v1738_v43 = vpop.f32.mrb[41].mxu0 }
 0x4e2   :  { %v1199_v44 = vpop.f32.mrb[42].mxu0 }
 0x4e3   :  { %v1739_v45 = vpop.f32.mrb[43].mxu0  ;;  %1757 = vmatmul.mubr.bf16.vlgmr.msra.gmra.mrb[40].mxu1 %v1202_v32 }
 0x5b6   :  { %v1305_v48 = vpop.f32.mrb[40].mxu1 }
 0x5b7   :  { %v1306_v49 = vadd.f32 %v1305_v48, %v1222_v47  ;;  %v1758_v50 = vpop.f32.mrb[41].mxu1 }
 0x5b8   :  { %v1308_v0 = vpop.f32.mrb[42].mxu1 }
 0x5b9   :  { %v1312_v51 = vadd.f32 %v1306_v49, %v2289_v22  ;;  %v1309_v52 = vadd.f32 %v1308_v0, %v1222_v47  ;;  %v1759_v53 = vpop.f32.mrb[43].mxu1 }
 0x5bb   :  { %v1313_v54 = vadd.f32 %v1309_v52, %v2291_v23  ;;  %1314 = vadd.xlane.f32.xlu0 %v1312_v51  ;;  %v1320_v55 = vmul.f32 %v1312_v51, %v1312_v51 }
 0x5bd   :  { %1316 = vadd.xlane.f32.xlu1 %v1313_v54  ;;  %v1321_v56 = vmul.f32 %v1313_v54, %v1313_v54 }
 0x5bf   :  { %1322 = vadd.xlane.f32.xlu0 %v1320_v55 }
 0x5c1   :  { %1324 = vadd.xlane.f32.xlu1 %v1321_v56 }
 0x648   :  { %v1315_v57 = vpop.xlane.xlu0 %1314 }
 0x649   :  { %v1318_v58 = vmul.f32 0.028571429, %v1315_v57 }
 0x64a   :  { %v1317_v59 = vpop.xlane.xlu1 %1316 }
 0x64b   :  { %v1319_v60 = vmul.f32 0.028571429, %v1317_v59  ;;  %v1328_v2 = vmul.f32 %v1318_v58, %v1318_v58  ;;  %v1334_v12 = vsub.f32 %v1312_v51, %v1318_v58 }
 0x64c   :  { %v1323_v62 = vpop.xlane.xlu0 %1322 }
 0x64d   :  { %v1326_v3 = vmul.f32 0.028571429, %v1323_v62  ;;  %v1329_v5 = vmul.f32 %v1319_v60, %v1319_v60  ;;  %v1335_v15 = vsub.f32 %v1313_v54, %v1319_v60 }
 0x64e   :  { %v1325_v4 = vpop.xlane.xlu1 %1324 }
 0x64f   :  { %v1330_v22 = vsub.f32 %v1326_v3, %v1328_v2  ;;  %v1327_v6 = vmul.f32 0.028571429, %v1325_v4 }
 0x651   :  { %v1332_v7 = vmax.f32 %v1330_v22, 0.0  ;;  %v1331_v8 = vsub.f32 %v1327_v6, %v1329_v5 }
 0x653   :  { %v1336_v23 = vadd.f32 1e-05, %v1332_v7  ;;  %v1333_v9 = vmax.f32 %v1331_v8, 0.0 }
 0x655   :  { %1848 = vrsqrt.f32 %v1336_v23  ;;  %v1337_v39 = vadd.f32 1e-05, %v1333_v9 }
 0x657   :  { %1850 = vrsqrt.f32 %v1337_v39 }
 0x65f   :  { %v1849_v14 = vpop.eup %1848 }
 0x660   :  { %v1340_v16 = vmul.f32 %v1849_v14, %v1334_v12 }
 0x661   :  { %v1851_v18 = vpop.eup %1850 }
 0x662   :  { %v1341_v19 = vmul.f32 %v1851_v18, %v1335_v15  ;;  %v1346_v20 = vmul.f32 %v1345_v13, %v1340_v16 }
 0x664   :  { %v1347_v21 = vmul.f32 %v1345_v13, %v1341_v19  ;;  %v1352_v24 = vadd.f32 %v1351_v17, %v1346_v20 }
 0x666   :  { %v1353_v25 = vadd.f32 %v1351_v17, %v1347_v21  ;;  %1354 = vst [vmem:[#allocation17] sm:$0xff] %v1352_v24 }
 0x668   :  { %1355 = vst [vmem:[#allocation17 + $0x8] sm:$0xff] %v1353_v25 }
 0x669   :  { %2061 = shalt.err (!%p2058_p6)
}
 0x66a   :  { %s2062_s10 = scalar_lea.hbm %s2467_s9, 256 }
 0x66b   :  { %p2063_p7 = scmp.ne.s32.totalorder %s2467_s9, %s2062_s10  ;;  %p2066_p8 = scmp.lt.u32.totalorder %s2062_s10, %s2467_s9 }
 0x66d   :  { %p2068_p9 = pnand %p2066_p8, %p2063_p7 }
 0x66f   :  { %2071 = shalt.err (!%p2068_p9)
}
 0x670   :  { %1367 = dma.vmem_to_hbm [thread:$0]  %s1362_s20, 256, %s2467_s9, [#allocation4], %s2091_s7, %s2091_s7, %s2092_s27  }
 0x671   :  { %2082 = dma.done.wait [#allocation4], 256  }
 0x672   :  { %2083 = vsyncadd [#allocation4], 4294967040 }
 0x673   :  { %1371 = vsyncpa [#allocation3], 1 }
 0x674   :  { %1372 = vsyncpa [#allocation6], 1 }
 0x675   :  { %1373 = vsyncpa [#allocation9], 1 }
 0x676   :  { %1374 = vsyncpa [#allocation12], 1 }
 0x677   :  { %1375 = vsyncpa [#allocation15], 1 }
 0x678   :  { %1376 = vsyncpa [#allocation4], 1 }

// kernel: tpu_custom_call.1
= control target key start
LH: loop header
LB: loop body
LE: loop exit
PB: predicated region body
PF: predicated region fallthrough
CT: control target
= control target key end

     0   :  { %14 = vsyncpa [#allocation3], 0  ;;  %s2458_s0 = inlined_call_operand.hbm [shape: f32[2,8,128], index: 0, kind: input, shape index: {}]   ;;  %s2459_s1 = inlined_call_operand.hbm [shape: bf16[2,128,128], index: 1, kind: input, shape index: {}]   ;;  %s2460_s2 = inlined_call_operand.hbm [shape: bf16[2,128,128], index: 2, kind: input, shape index: {}]   ;;  %s2461_s3 = inlined_call_operand.hbm [shape: bf16[128,128], index: 3, kind: input, shape index: {}]   ;;  %s2462_s4 = inlined_call_operand.hbm [shape: bf16[128,128], index: 4, kind: input, shape index: {}]   ;;  %s2463_s5 = inlined_call_operand.hbm [shape: bf16[128,128], index: 5, kind: input, shape index: {}]   ;;  %s2464_s6 = inlined_call_operand.hbm [shape: bf16[128,128], index: 6, kind: input, shape index: {}]   ;;  %s2465_s7 = inlined_call_operand.hbm [shape: f32[8,128], index: 7, kind: input, shape index: {}]   ;;  %s2466_s8 = inlined_call_operand.hbm [shape: f32[1,128], index: 8, kind: input, shape index: {}]   ;;  %s2467_s9 = inlined_call_operand.hbm [shape: f32[2,8,128], index: 9, kind: output, shape index: {}]  }
   0x1   :  { %15 = vsyncpa [#allocation6], 0 }
   0x2   :  { %16 = vsyncpa [#allocation9], 0 }
   0x3   :  { %17 = vsyncpa [#allocation12], 0 }
   0x4   :  { %18 = vsyncpa [#allocation15], 0 }
   0x5   :  { %19 = vsyncpa [#allocation4], 0  ;;  %s2084_s30 = smov [#allocation5]   ;;  %s1852_s13 = scalar_lea.hbm %s2459_s1, 2048 }
   0x6   :  { %s37_s10 = sshll.u32 %s2084_s30, 4  ;;  %p1853_p0 = scmp.ne.s32.totalorder %s2459_s1, %s1852_s13  ;;  %s38_s10 = int_to_ptr.vmem [resolvable:$true] %s37_s10 }
   0x7   :  { %p1856_p1 = scmp.lt.u32.totalorder %s1852_s13, %s2459_s1 }
   0x9   :  { %p1858_p2 = pnand %p1856_p1, %p1853_p0 }
   0xb   :  { %1861 = shalt.err (!%p1858_p2)
}
   0xc   :  { %s1862_s18 = scalar_lea.vmem %s38_s10, 2048  ;;  %p1867_p4 = scmp.lt.s32.totalorder %s38_s10, %s38_s10 }
   0xd   :  { %p1863_p3 = scmp.ne.s32.totalorder %s38_s10, %s1862_s18  ;;  %p1868_p5 = scmp.lt.s32.totalorder %s1862_s18, %s1862_s18 }
   0xf   :  { %p1869_p6 = por %p1868_p5, %p1867_p4 }
  0x11   :  { %p1870_p7 = pnand %p1869_p6, %p1863_p3 }
  0x13   :  { %1873 = shalt.err (!%p1870_p7)
}
  0x14   :  { %s2085_s19 = smov 64   ;;  %s2086_s20 = smov 4  }
  0x15   :  { %43 = dma.hbm_to_vmem [thread:$0]  %s2459_s1, 2048, %s38_s10, [#allocation6], %s2085_s19, %s2085_s19, %s2086_s20  }
  0x16   :  { %s2087_s23 = smov [#allocation8]   ;;  %s2088_s25 = smov [#allocation11]  }
  0x17   :  { %s61_s24 = sshll.u32 %s2087_s23, 4  ;;  %s85_s26 = sshll.u32 %s2088_s25, 4  ;;  %s62_s24 = int_to_ptr.vmem [resolvable:$true] %s61_s24  ;;  %s86_s26 = int_to_ptr.vmem [resolvable:$true] %s85_s26 }
  0x18   :  { %s1874_s29 = scalar_lea.hbm %s2461_s3, 1024 }
  0x19   :  { %p1875_p8 = scmp.ne.s32.totalorder %s2461_s3, %s1874_s29  ;;  %p1878_p9 = scmp.lt.u32.totalorder %s1874_s29, %s2461_s3 }
  0x1b   :  { %p1880_p10 = pnand %p1878_p9, %p1875_p8 }
  0x1d   :  { %1883 = shalt.err (!%p1880_p10)
}
  0x1e   :  { %s1884_s1 = scalar_lea.vmem %s62_s24, 1024  ;;  %p1889_p12 = scmp.lt.s32.totalorder %s62_s24, %s62_s24 }
  0x1f   :  { %p1885_p11 = scmp.ne.s32.totalorder %s62_s24, %s1884_s1  ;;  %p1890_p13 = scmp.lt.s32.totalorder %s1884_s1, %s1884_s1 }
  0x21   :  { %p1891_p0 = por %p1890_p13, %p1889_p12 }
  0x23   :  { %p1892_p1 = pnand %p1891_p0, %p1885_p11 }
  0x25   :  { %1895 = shalt.err (!%p1892_p1)
}
  0x26   :  { %67 = dma.hbm_to_vmem [thread:$0]  %s2461_s3, 1024, %s62_s24, [#allocation9], %s2085_s19, %s2085_s19, %s2086_s20  }
  0x27   :  { %s1896_s17 = scalar_lea.hbm %s2463_s5, 1024 }
  0x28   :  { %p1897_p2 = scmp.ne.s32.totalorder %s2463_s5, %s1896_s17  ;;  %p1900_p3 = scmp.lt.u32.totalorder %s1896_s17, %s2463_s5 }
  0x2a   :  { %p1902_p4 = pnand %p1900_p3, %p1897_p2 }
  0x2c   :  { %1905 = shalt.err (!%p1902_p4)
}
  0x2d   :  { %s1906_s25 = scalar_lea.vmem %s86_s26, 1024  ;;  %p1911_p6 = scmp.lt.s32.totalorder %s86_s26, %s86_s26 }
  0x2e   :  { %p1907_p5 = scmp.ne.s32.totalorder %s86_s26, %s1906_s25  ;;  %p1912_p7 = scmp.lt.s32.totalorder %s1906_s25, %s1906_s25 }
  0x30   :  { %p1913_p8 = por %p1912_p7, %p1911_p6 }
  0x32   :  { %p1914_p9 = pnand %p1913_p8, %p1907_p5 }
  0x34   :  { %1917 = shalt.err (!%p1914_p9)
}
  0x35   :  { %91 = dma.hbm_to_vmem [thread:$0]  %s2463_s5, 1024, %s86_s26, [#allocation12], %s2085_s19, %s2085_s19, %s2086_s20  }
  0x36   :  { %s2089_s27 = smov [#allocation14]   ;;  %s2090_s29 = smov [#allocation2]  }
  0x37   :  { %s110_s28 = sshll.u32 %s2089_s27, 4  ;;  %s25_s30 = sshll.u32 %s2090_s29, 4  ;;  %s111_s28 = int_to_ptr.vmem [resolvable:$true] %s110_s28  ;;  %s26_s30 = int_to_ptr.vmem [resolvable:$true] %s25_s30 }
  0x38   :  { %s1918_s13 = scalar_lea.hbm %s2465_s7, 128 }
  0x39   :  { %p1919_p10 = scmp.ne.s32.totalorder %s2465_s7, %s1918_s13  ;;  %p1922_p11 = scmp.lt.u32.totalorder %s1918_s13, %s2465_s7 }
  0x3b   :  { %p1924_p12 = pnand %p1922_p11, %p1919_p10 }
  0x3d   :  { %1927 = shalt.err (!%p1924_p12)
}
  0x3e   :  { %s1928_s5 = scalar_lea.vmem %s111_s28, 128  ;;  %p1933_p0 = scmp.lt.s32.totalorder %s111_s28, %s111_s28 }
  0x3f   :  { %p1929_p13 = scmp.ne.s32.totalorder %s111_s28, %s1928_s5  ;;  %p1934_p1 = scmp.lt.s32.totalorder %s1928_s5, %s1928_s5 }
  0x41   :  { %p1935_p2 = por %p1934_p1, %p1933_p0 }
  0x43   :  { %p1936_p3 = pnand %p1935_p2, %p1929_p13 }
  0x45   :  { %1939 = shalt.err (!%p1936_p3)
}
  0x46   :  { %113 = dma.hbm_to_vmem [thread:$0]  %s2465_s7, 128, %s111_s28, [#allocation15]  }
  0x47   :  { %s1940_s21 = scalar_lea.hbm %s2458_s0, 256 }
  0x48   :  { %p1941_p4 = scmp.ne.s32.totalorder %s2458_s0, %s1940_s21  ;;  %p1944_p5 = scmp.lt.u32.totalorder %s1940_s21, %s2458_s0 }
  0x4a   :  { %p1946_p6 = pnand %p1944_p5, %p1941_p4 }
  0x4c   :  { %1949 = shalt.err (!%p1946_p6)
}
  0x4d   :  { %s1950_s24 = scalar_lea.vmem %s26_s30, 256  ;;  %p1955_p8 = scmp.lt.s32.totalorder %s26_s30, %s26_s30 }
  0x4e   :  { %p1951_p7 = scmp.ne.s32.totalorder %s26_s30, %s1950_s24  ;;  %p1956_p9 = scmp.lt.s32.totalorder %s1950_s24, %s1950_s24 }
  0x50   :  { %p1957_p10 = por %p1956_p9, %p1955_p8 }
  0x52   :  { %p1958_p11 = pnand %p1957_p10, %p1951_p7 }
  0x54   :  { %1961 = shalt.err (!%p1958_p11)
}
  0x55   :  { %s2091_s7 = smov 128   ;;  %s2092_s27 = smov 8  }
  0x56   :  { %31 = dma.hbm_to_vmem [thread:$0]  %s2458_s0, 256, %s26_s30, [#allocation3], %s2091_s7, %s2091_s7, %s2092_s27  }
  0x57   :  { %s2093_s11 = smov [#allocation7]   ;;  %s2094_s13 = smov [#allocation10]  }
  0x58   :  { %s49_s12 = sshll.u32 %s2093_s11, 4  ;;  %s73_s1 = sshll.u32 %s2094_s13, 4  ;;  %s50_s12 = int_to_ptr.vmem [resolvable:$true] %s49_s12  ;;  %s74_s1 = int_to_ptr.vmem [resolvable:$true] %s73_s1 }
  0x59   :  { %s1962_s15 = scalar_lea.hbm %s2460_s2, 2048 }
  0x5a   :  { %p1963_p12 = scmp.ne.s32.totalorder %s2460_s2, %s1962_s15  ;;  %p1966_p13 = scmp.lt.u32.totalorder %s1962_s15, %s2460_s2 }
  0x5c   :  { %p1968_p0 = pnand %p1966_p13, %p1963_p12 }
  0x5e   :  { %1971 = shalt.err (!%p1968_p0)
}
  0x5f   :  { %s1972_s0 = scalar_lea.vmem %s50_s12, 2048  ;;  %p1977_p2 = scmp.lt.s32.totalorder %s50_s12, %s50_s12 }
  0x60   :  { %p1973_p1 = scmp.ne.s32.totalorder %s50_s12, %s1972_s0  ;;  %p1978_p3 = scmp.lt.s32.totalorder %s1972_s0, %s1972_s0 }
  0x62   :  { %p1979_p4 = por %p1978_p3, %p1977_p2 }
  0x64   :  { %p1980_p5 = pnand %p1979_p4, %p1973_p1 }
  0x66   :  { %1983 = shalt.err (!%p1980_p5)
}
  0x67   :  { %55 = dma.hbm_to_vmem [thread:$0]  %s2460_s2, 2048, %s50_s12, [#allocation6], %s2085_s19, %s2085_s19, %s2086_s20  }
  0x68   :  { %s1984_s23 = scalar_lea.hbm %s2462_s4, 1024 }
  0x69   :  { %p1985_p6 = scmp.ne.s32.totalorder %s2462_s4, %s1984_s23  ;;  %p1988_p7 = scmp.lt.u32.totalorder %s1984_s23, %s2462_s4 }
  0x6b   :  { %p1990_p8 = pnand %p1988_p7, %p1985_p6 }
  0x6d   :  { %1993 = shalt.err (!%p1990_p8)
}
  0x6e   :  { %s1994_s29 = scalar_lea.vmem %s74_s1, 1024  ;;  %p1999_p10 = scmp.lt.s32.totalorder %s74_s1, %s74_s1 }
  0x6f   :  { %p1995_p9 = scmp.ne.s32.totalorder %s74_s1, %s1994_s29  ;;  %p2000_p11 = scmp.lt.s32.totalorder %s1994_s29, %s1994_s29 }
  0x71   :  { %p2001_p12 = por %p2000_p11, %p1999_p10 }
  0x73   :  { %p2002_p13 = pnand %p2001_p12, %p1995_p9 }
  0x75   :  { %2005 = shalt.err (!%p2002_p13)
}
  0x76   :  { %79 = dma.hbm_to_vmem [thread:$0]  %s2462_s4, 1024, %s74_s1, [#allocation9], %s2085_s19, %s2085_s19, %s2086_s20  }
  0x77   :  { %s2095_s12 = smov [#allocation13]   ;;  %s2096_s10 = smov [#allocation16]  }
  0x78   :  { %s97_s13 = sshll.u32 %s2095_s12, 4  ;;  %s120_s14 = sshll.u32 %s2096_s10, 4  ;;  %s98_s13 = int_to_ptr.vmem [resolvable:$true] %s97_s13  ;;  %s121_s14 = int_to_ptr.vmem [resolvable:$true] %s120_s14 }
  0x79   :  { %s2006_s26 = scalar_lea.hbm %s2464_s6, 1024 }
  0x7a   :  { %p2007_p0 = scmp.ne.s32.totalorder %s2464_s6, %s2006_s26  ;;  %p2010_p1 = scmp.lt.u32.totalorder %s2006_s26, %s2464_s6 }
  0x7c   :  { %p2012_p2 = pnand %p2010_p1, %p2007_p0 }
  0x7e   :  { %2015 = shalt.err (!%p2012_p2)
}
  0x7f   :  { %s2016_s4 = scalar_lea.vmem %s98_s13, 1024  ;;  %p2021_p4 = scmp.lt.s32.totalorder %s98_s13, %s98_s13 }
  0x80   :  { %p2017_p3 = scmp.ne.s32.totalorder %s98_s13, %s2016_s4  ;;  %p2022_p5 = scmp.lt.s32.totalorder %s2016_s4, %s2016_s4 }
  0x82   :  { %p2023_p6 = por %p2022_p5, %p2021_p4 }
  0x84   :  { %p2024_p7 = pnand %p2023_p6, %p2017_p3 }
  0x86   :  { %2027 = shalt.err (!%p2024_p7)
}
  0x87   :  { %103 = dma.hbm_to_vmem [thread:$0]  %s2464_s6, 1024, %s98_s13, [#allocation12], %s2085_s19, %s2085_s19, %s2086_s20  }
  0x88   :  { %s2028_s23 = scalar_lea.hbm %s2466_s8, 16 }
  0x89   :  { %p2029_p8 = scmp.ne.s32.totalorder %s2466_s8, %s2028_s23  ;;  %p2032_p9 = scmp.lt.u32.totalorder %s2028_s23, %s2466_s8 }
  0x8b   :  { %p2034_p10 = pnand %p2032_p9, %p2029_p8 }
  0x8d   :  { %2037 = shalt.err (!%p2034_p10)
}
  0x8e   :  { %s2038_s29 = scalar_lea.vmem %s121_s14, 16  ;;  %s2042_s2 = scalar_lea.vmem %s121_s14, 32 }
  0x8f   :  { %p2039_p11 = scmp.ne.s32.totalorder %s121_s14, %s2038_s29  ;;  %p2043_p12 = scmp.lt.s32.totalorder %s121_s14, %s121_s14 }
  0x90   :  { %p2044_p13 = scmp.lt.s32.totalorder %s2042_s2, %s2038_s29 }
  0x92   :  { %p2045_p0 = por %p2044_p13, %p2043_p12 }
  0x94   :  { %p2046_p1 = pnand %p2045_p0, %p2039_p11 }
  0x96   :  { %2049 = shalt.err (!%p2046_p1)
}
  0x97   :  { %123 = dma.hbm_to_vmem [thread:$0]  %s2466_s8, 16, %s121_s14, [#allocation15]  }
  0x98   :  { %2072 = dma.done.wait [#allocation3], 256  }
  0x99   :  { %2073 = vsyncadd [#allocation3], 4294967040 }
  0x9a   :  { %2074 = dma.done.wait [#allocation6], 4096  }
  0x9b   :  { %2075 = vsyncadd [#allocation6], 4294963200 }
  0x9c   :  { %2076 = dma.done.wait [#allocation9], 2048  }
  0x9d   :  { %2077 = vsyncadd [#allocation9], 4294965248 }
  0x9e   :  { %2078 = dma.done.wait [#allocation12], 2048  }
  0x9f   :  { %2079 = vsyncadd [#allocation12], 4294965248 }
  0xa0   :  { %2080 = dma.done.wait [#allocation15], 144  }
  0xa1   :  { %2081 = vsyncadd [#allocation15], 4294967152  ;;  %v2097_v0 = vmov 0.0   ;;  %vm2098_vm0 = vmmov 0   ;;  %v1776_v1 = vld [vmem:[#allocation10] sm:$0xff]   ;;  %v1777_v2 = vld [vmem:[#allocation10 + $0x8] sm:$0xff]   ;;  %v172_v60 = vlaneseq }
  0xa2   :  { %1544 = vmatprep.subr.bf16.mxu0 %v2097_v0  ;;  %1560 = vmatprep.mubr.msk.bf16.mxu0 %vm2098_vm0, %v2097_v0  ;;  %v1778_v3 = vld [vmem:[#allocation10 + $0x10] sm:$0xff]   ;;  %v1779_v4 = vld [vmem:[#allocation10 + $0x18] sm:$0xff]   ;;  %v1784_v5 = vld [vmem:[#allocation5] sm:$0xff]   ;;  %s2099_s8 = smov [#allocation17]  }
  0xa3   :  { %1564 = vmatprep.subr.bf16.mxu1 %v1776_v1  ;;  %1580 = vmatprep.mubr.bf16.mxu1 %v1784_v5  ;;  %v1780_v6 = vld [vmem:[#allocation10 + $0x20] sm:$0xff]   ;;  %v1781_v7 = vld [vmem:[#allocation10 + $0x28] sm:$0xff]   ;;  %v1782_v9 = vld [vmem:[#allocation10 + $0x30] sm:$0xff]   ;;  %v2301_v61 = vshrl.u32 %v172_v60, 7  ;;  %s1361_s20 = sshll.u32 %s2099_s8, 4  ;;  %s1362_s20 = int_to_ptr.vmem [resolvable:$true] %s1361_s20 }
  0xa4   :  { %1565 = vmatpush3.bf16.msra.mxu1 %v1776_v1  ;;  %v1794_v8 = vld [vmem:[#allocation8] sm:$0xff]   ;;  %v1795_v10 = vld [vmem:[#allocation8 + $0x8] sm:$0xff]   ;;  %v1783_v11 = vld [vmem:[#allocation10 + $0x38] sm:$0xff]   ;;  %s2050_s11 = scalar_lea.vmem %s1362_s20, 256  ;;  %p2055_p3 = scmp.lt.s32.totalorder %s1362_s20, %s1362_s20 }
  0xa5   :  { %1566 = vmatprep.subr.bf16.mxu1 %v1777_v2  ;;  %1545 = vmatpush3.bf16.msra.mxu0 %v1794_v8  ;;  %v1796_v12 = vld [vmem:[#allocation8 + $0x10] sm:$0xff]   ;;  %v1798_v13 = vld [vmem:[#allocation8 + $0x18] sm:$0xff]   ;;  %v1785_v14 = vld [vmem:[#allocation5 + $0x8] sm:$0xff]   ;;  %v315_v62 = vsub.s32 1, %v2301_v61  ;;  %p2051_p2 = scmp.ne.s32.totalorder %s1362_s20, %s2050_s11  ;;  %p2056_p4 = scmp.lt.s32.totalorder %s2050_s11, %s2050_s11 }
  0xa6   :  { %1546 = vmatprep.subr.bf16.mxu0 %v2097_v0  ;;  %v1786_v15 = vld [vmem:[#allocation5 + $0x10] sm:$0xff]   ;;  %v1800_v16 = vld [vmem:[#allocation8 + $0x20] sm:$0xff]   ;;  %v1801_v17 = vld [vmem:[#allocation8 + $0x28] sm:$0xff]  }
  0xa7   :  { %v1787_v18 = vld [vmem:[#allocation5 + $0x18] sm:$0xff]   ;;  %v1788_v19 = vld [vmem:[#allocation5 + $0x20] sm:$0xff]   ;;  %v1802_v20 = vld [vmem:[#allocation8 + $0x30] sm:$0xff]   ;;  %p2057_p5 = por %p2056_p4, %p2055_p3 }
  0xa8   :  { %1567 = vmatpush3.bf16.msra.mxu1 %v1777_v2  ;;  %v1804_v21 = vld [vmem:[#allocation8 + $0x38] sm:$0xff]   ;;  %v2289_v22 = vld [vmem:[#allocation2] sm:$0xff]  ;;  %v1789_v24 = vld [vmem:[#allocation5 + $0x28] sm:$0xff]  }
  0xa9   :  { %1568 = vmatprep.subr.bf16.mxu1 %v1778_v3  ;;  %1547 = vmatpush3.bf16.msra.mxu0 %v1795_v10  ;;  %v2291_v23 = vld [vmem:[#allocation2 + $0x8] sm:$0xff]  ;;  %v1790_v25 = vld [vmem:[#allocation5 + $0x30] sm:$0xff]   ;;  %v1792_v28 = vld [vmem:[#allocation5 + $0x40] sm:$0xff]   ;;  %p2058_p6 = pnand %p2057_p5, %p2051_p2 }
  0xaa   :  { %1548 = vmatprep.subr.bf16.mxu0 %v2097_v0  ;;  %v154_v26 = vpack.c.bf16 %v2291_v23, %v2289_v22  ;;  %v1791_v27 = vld [vmem:[#allocation5 + $0x38] sm:$0xff]   ;;  %v1793_v29 = vld [vmem:[#allocation5 + $0x48] sm:$0xff]   ;;  %v1797_v30 = vld [vmem:[#allocation5 + $0x50] sm:$0xff]  }
  0xab   :  { %v1799_v31 = vld [vmem:[#allocation5 + $0x58] sm:$0xff]   ;;  %v1803_v32 = vld [vmem:[#allocation5 + $0x60] sm:$0xff]   ;;  %v1805_v33 = vld [vmem:[#allocation5 + $0x68] sm:$0xff]  }
  0xac   :  { %1569 = vmatpush3.bf16.msra.mxu1 %v1778_v3  ;;  %v1806_v34 = vld [vmem:[#allocation5 + $0x70] sm:$0xff]   ;;  %v1807_v35 = vld [vmem:[#allocation5 + $0x78] sm:$0xff]   ;;  %v1808_v36 = vld [vmem:[#allocation11] sm:$0xff]  }
  0xad   :  { %1570 = vmatprep.subr.bf16.mxu1 %v1779_v4  ;;  %1549 = vmatpush3.bf16.msra.mxu0 %v1796_v12  ;;  %v1809_v37 = vld [vmem:[#allocation11 + $0x8] sm:$0xff]   ;;  %v1810_v38 = vld [vmem:[#allocation11 + $0x10] sm:$0xff]   ;;  %v1811_v39 = vld [vmem:[#allocation11 + $0x18] sm:$0xff]  }
  0xae   :  { %1550 = vmatprep.subr.bf16.mxu0 %v2097_v0  ;;  %v1812_v40 = vld [vmem:[#allocation11 + $0x20] sm:$0xff]   ;;  %v1813_v41 = vld [vmem:[#allocation11 + $0x28] sm:$0xff]   ;;  %v1814_v42 = vld [vmem:[#allocation11 + $0x30] sm:$0xff]  }
  0xaf   :  { %v1815_v43 = vld [vmem:[#allocation11 + $0x38] sm:$0xff]   ;;  %v1816_v44 = vld [vmem:[#allocation7] sm:$0xff]   ;;  %v1817_v45 = vld [vmem:[#allocation7 + $0x8] sm:$0xff]  }
  0xb0   :  { %1571 = vmatpush3.bf16.msra.mxu1 %v1779_v4  ;;  %v1818_v46 = vld [vmem:[#allocation7 + $0x10] sm:$0xff]   ;;  %v1819_v47 = vld [vmem:[#allocation7 + $0x18] sm:$0xff]   ;;  %v1820_v48 = vld [vmem:[#allocation7 + $0x20] sm:$0xff]  }
  0xb1   :  { %1572 = vmatprep.subr.bf16.mxu1 %v1780_v6  ;;  %1551 = vmatpush3.bf16.msra.mxu0 %v1798_v13  ;;  %v1821_v49 = vld [vmem:[#allocation7 + $0x28] sm:$0xff]   ;;  %v1822_v50 = vld [vmem:[#allocation7 + $0x30] sm:$0xff]   ;;  %v1823_v51 = vld [vmem:[#allocation7 + $0x38] sm:$0xff]  }
  0xb2   :  { %1552 = vmatprep.subr.bf16.mxu0 %v2097_v0  ;;  %v1824_v52 = vld [vmem:[#allocation7 + $0x40] sm:$0xff]   ;;  %v1825_v53 = vld [vmem:[#allocation7 + $0x48] sm:$0xff]   ;;  %v1826_v54 = vld [vmem:[#allocation7 + $0x50] sm:$0xff]  }
  0xb3   :  { %v1827_v55 = vld [vmem:[#allocation7 + $0x58] sm:$0xff]   ;;  %v1828_v56 = vld [vmem:[#allocation7 + $0x60] sm:$0xff]   ;;  %v1829_v57 = vld [vmem:[#allocation7 + $0x68] sm:$0xff]  }
  0xb4   :  { %1573 = vmatpush3.bf16.msra.mxu1 %v1780_v6  ;;  %v1830_v58 = vld [vmem:[#allocation7 + $0x70] sm:$0xff]   ;;  %v1831_v59 = vld [vmem:[#allocation7 + $0x78] sm:$0xff]   ;;  %v2304_v63 = vld [vmem:[#allocation14] sm:$0xff] }
  0xb5   :  { %1574 = vmatprep.subr.bf16.mxu1 %v1781_v7  ;;  %1553 = vmatpush3.bf16.msra.mxu0 %v1800_v16  ;;  %v2307_v1 = vrot.slane %v2304_v63, %v315_v62 }
  0xb6   :  { %1554 = vmatprep.subr.bf16.mxu0 %v2097_v0 }
  0xb8   :  { %1575 = vmatpush3.bf16.msra.mxu1 %v1781_v7 }
  0xb9   :  { %1576 = vmatprep.subr.bf16.mxu1 %v1782_v9  ;;  %1555 = vmatpush3.bf16.msra.mxu0 %v1801_v17 }
  0xba   :  { %1556 = vmatprep.subr.bf16.mxu0 %v2097_v0 }
  0xbc   :  { %1577 = vmatpush3.bf16.msra.mxu1 %v1782_v9 }
  0xbd   :  { %1578 = vmatprep.subr.bf16.mxu1 %v1783_v11  ;;  %1557 = vmatpush3.bf16.msra.mxu0 %v1802_v20 }
  0xbe   :  { %1558 = vmatprep.subr.bf16.mxu0 %v2097_v0 }
  0xc0   :  { %1579 = vmatpush3.bf16.msra.mxu1 %v1783_v11 }
  0xc1   :  { %1660 = vmatprep.subr.bf16.mxu1 %v2097_v0  ;;  %1559 = vmatpush3.bf16.msra.mxu0 %v1804_v21 }
  0xc2   :  { %1612 = vmatprep.subr.bf16.mxu0 %v1808_v36 }
  0xc3   :  { %1581 = vmatmul.mubr.bf16.vlgmr.msra.gmra.mrb[0].mxu1 %v1785_v14 }
  0xc4   :  { %1584 = vmatprep.mubr.bf16.mxu1 %v1786_v15  ;;  %1561 = vmatmul.mubr.bf16.vlgmr.msra.gmra.mrb[0].mxu0 %v154_v26 }
  0xc5   :  { %1613 = vmatpush3.bf16.msra.mxu0 %v1808_v36  ;;  %1628 = vmatprep.mubr.bf16.mxu0 %v1816_v44 }
  0xc6   :  { %1614 = vmatprep.subr.bf16.mxu0 %v1809_v37 }
  0xc9   :  { %1615 = vmatpush3.bf16.msra.mxu0 %v1809_v37 }
  0xca   :  { %1616 = vmatprep.subr.bf16.mxu0 %v1810_v38 }
  0xcb   :  { %1585 = vmatmul.mubr.bf16.gmra.mrb[4].mxu1 %v1787_v18 }
  0xcc   :  { %1588 = vmatprep.mubr.bf16.mxu1 %v1788_v19 }
  0xcd   :  { %1617 = vmatpush3.bf16.msra.mxu0 %v1810_v38 }
  0xce   :  { %1618 = vmatprep.subr.bf16.mxu0 %v1811_v39 }
  0xd1   :  { %1619 = vmatpush3.bf16.msra.mxu0 %v1811_v39 }
  0xd2   :  { %1620 = vmatprep.subr.bf16.mxu0 %v1812_v40 }
  0xd3   :  { %1589 = vmatmul.mubr.bf16.gmra.mrb[8].mxu1 %v1789_v24 }
  0xd4   :  { %1592 = vmatprep.mubr.bf16.mxu1 %v1790_v25 }
  0xd5   :  { %1621 = vmatpush3.bf16.msra.mxu0 %v1812_v40 }
  0xd6   :  { %1622 = vmatprep.subr.bf16.mxu0 %v1813_v41 }
  0xd9   :  { %1623 = vmatpush3.bf16.msra.mxu0 %v1813_v41 }
  0xda   :  { %1624 = vmatprep.subr.bf16.mxu0 %v1814_v42 }
  0xdb   :  { %1593 = vmatmul.mubr.bf16.gmra.mrb[12].mxu1 %v1791_v27 }
  0xdc   :  { %1596 = vmatprep.mubr.bf16.mxu1 %v1792_v28 }
  0xdd   :  { %1625 = vmatpush3.bf16.msra.mxu0 %v1814_v42 }
  0xde   :  { %1626 = vmatprep.subr.bf16.mxu0 %v1815_v43 }
  0xe1   :  { %1627 = vmatpush3.bf16.msra.mxu0 %v1815_v43 }
  0xe2   :  { %1680 = vmatprep.subr.bf16.mxu0 %v2097_v0 }
  0xe3   :  { %1597 = vmatmul.mubr.bf16.gmra.mrb[16].mxu1 %v1793_v29 }
  0xe4   :  { %1600 = vmatprep.mubr.bf16.mxu1 %v1797_v30  ;;  %1629 = vmatmul.mubr.bf16.vlgmr.msra.gmra.mrb[4].mxu0 %v1817_v45 }
  0xe5   :  { %1632 = vmatprep.mubr.bf16.mxu0 %v1818_v46 }
  0xeb   :  { %1601 = vmatmul.mubr.bf16.gmra.mrb[20].mxu1 %v1799_v31 }
  0xec   :  { %1604 = vmatprep.mubr.bf16.mxu1 %v1803_v32  ;;  %1633 = vmatmul.mubr.bf16.gmra.mrb[8].mxu0 %v1819_v47 }
  0xed   :  { %1636 = vmatprep.mubr.bf16.mxu0 %v1820_v48 }
  0xf3   :  { %1605 = vmatmul.mubr.bf16.gmra.mrb[24].mxu1 %v1805_v33 }
  0xf4   :  { %1608 = vmatprep.mubr.bf16.mxu1 %v1806_v34  ;;  %1637 = vmatmul.mubr.bf16.gmra.mrb[12].mxu0 %v1821_v49 }
  0xf5   :  { %1640 = vmatprep.mubr.bf16.mxu0 %v1822_v50 }
  0xfb   :  { %1609 = vmatmul.mubr.bf16.gmra.mrb[28].mxu1 %v1807_v35 }
  0xfc   :  { %1676 = vmatprep.mubr.msk.bf16.mxu1 %vm2098_vm0, %v2097_v0  ;;  %1641 = vmatmul.mubr.bf16.gmra.mrb[16].mxu0 %v1823_v51 }
  0xfd   :  { %1644 = vmatprep.mubr.bf16.mxu0 %v1824_v52 }
 0x104   :  { %1645 = vmatmul.mubr.bf16.gmra.mrb[20].mxu0 %v1825_v53 }
 0x105   :  { %1648 = vmatprep.mubr.bf16.mxu0 %v1826_v54 }
 0x10c   :  { %1649 = vmatmul.mubr.bf16.gmra.mrb[24].mxu0 %v1827_v55 }
 0x10d   :  { %1652 = vmatprep.mubr.bf16.mxu0 %v1828_v56 }
 0x114   :  { %1653 = vmatmul.mubr.bf16.gmra.mrb[28].mxu0 %v1829_v57 }
 0x115   :  { %1656 = vmatprep.mubr.bf16.mxu0 %v1830_v58 }
 0x11c   :  { %1657 = vmatmul.mubr.bf16.gmra.mrb[32].mxu0 %v1831_v59 }
 0x11d   :  { %1696 = vmatprep.mubr.msk.bf16.mxu0 %vm2098_vm0, %v2097_v0 }
 0x196   :  { %v1582_v2 = vpop.f32.mrb[0].mxu1 }
 0x197   :  { %v495_v3 = vpop.f32.mrb[1].mxu1  ;;  %v504_v5 = vadd.f32 %v1582_v2, %v2307_v1  ;;  %v2319_v26 = vpop.f32.mrb[0].mxu0 }
 0x198   :  { %v1583_v4 = vpop.f32.mrb[2].mxu1  ;;  %v496_v8 = vadd.f32 %v495_v3, %v2307_v1  ;;  %v1562_v28 = vpop.f32.mrb[1].mxu0 }
 0x199   :  { %v507_v6 = vadd.f32 %v1583_v4, %v2307_v1  ;;  %v498_v7 = vpop.f32.mrb[3].mxu1  ;;  %v2323_v32 = vpop.f32.mrb[2].mxu0 }
 0x19a   :  { %v499_v9 = vadd.f32 %v498_v7, %v2307_v1  ;;  %v1563_v35 = vpop.f32.mrb[3].mxu0 }
 0x19b   :  { %v984_v10 = vpack.c.bf16 %v507_v6, %v504_v5 }
 0x19c   :  { %v983_v11 = vpack.c.bf16 %v499_v9, %v496_v8 }
 0x19e   :  { %v1586_v12 = vpop.f32.mrb[4].mxu1  ;;  %1661 = vmatpush3.bf16.xpose.msra.mxu1 %v983_v11 }
 0x19f   :  { %v511_v13 = vpop.f32.mrb[5].mxu1  ;;  %1662 = vmatprep.subr.bf16.mxu1 %v2097_v0  ;;  %v520_v15 = vadd.f32 %v1586_v12, %v2307_v1 }
 0x1a0   :  { %v1587_v14 = vpop.f32.mrb[6].mxu1  ;;  %v512_v18 = vadd.f32 %v511_v13, %v2307_v1 }
 0x1a1   :  { %v523_v16 = vadd.f32 %v1587_v14, %v2307_v1  ;;  %v514_v17 = vpop.f32.mrb[7].mxu1  ;;  %v174_v14 = vsub.s32 0, %v2301_v61 }
 0x1a2   :  { %v515_v19 = vadd.f32 %v514_v17, %v2307_v1 }
 0x1a3   :  { %v986_v20 = vpack.c.bf16 %v523_v16, %v520_v15 }
 0x1a4   :  { %v985_v21 = vpack.c.bf16 %v515_v19, %v512_v18  ;;  %v175_v19 = vrot.slane %v2304_v63, %v174_v14 }
 0x1a6   :  { %v1590_v24 = vpop.f32.mrb[8].mxu1  ;;  %1663 = vmatpush3.bf16.xpose.msra.mxu1 %v984_v10  ;;  %v259_v28 = vadd.f32 %v2319_v26, %v175_v19 }
 0x1a7   :  { %v527_v25 = vpop.f32.mrb[9].mxu1  ;;  %1664 = vmatprep.subr.bf16.mxu1 %v2097_v0  ;;  %v536_v29 = vadd.f32 %v1590_v24, %v2307_v1 }
 0x1a8   :  { %v1591_v27 = vpop.f32.mrb[10].mxu1  ;;  %v528_v33 = vadd.f32 %v527_v25, %v2307_v1  ;;  %v979_v35 = vmul.f32 0.16903085, %v259_v28 }
 0x1a9   :  { %v539_v30 = vadd.f32 %v1591_v27, %v2307_v1  ;;  %v530_v31 = vpop.f32.mrb[11].mxu1 }
 0x1aa   :  { %v531_v34 = vadd.f32 %v530_v31, %v2307_v1 }
 0x1ab   :  { %v988_v36 = vpack.c.bf16 %v539_v30, %v536_v29 }
 0x1ac   :  { %v987_v37 = vpack.c.bf16 %v531_v34, %v528_v33 }
 0x1ae   :  { %v1594_v38 = vpop.f32.mrb[12].mxu1  ;;  %1665 = vmatpush3.bf16.xpose.msra.mxu1 %v985_v21 }
 0x1af   :  { %v543_v39 = vpop.f32.mrb[13].mxu1  ;;  %1666 = vmatprep.subr.bf16.mxu1 %v2097_v0  ;;  %v2329_v41 = vadd.f32 %v1594_v38, %v2307_v1  ;;  %v672_v38 = vsub.s32 2, %v2301_v61 }
 0x1b0   :  { %v1595_v40 = vpop.f32.mrb[14].mxu1  ;;  %v544_v44 = vadd.f32 %v543_v39, %v2307_v1 }
 0x1b1   :  { %v2332_v42 = vadd.f32 %v1595_v40, %v2307_v1  ;;  %v546_v43 = vpop.f32.mrb[15].mxu1  ;;  %v2377_v39 = vrot.slane %v2304_v63, %v672_v38 }
 0x1b2   :  { %v547_v45 = vadd.f32 %v546_v43, %v2307_v1 }
 0x1b3   :  { %v990_v46 = vpack.c.bf16 %v2332_v42, %v2329_v41 }
 0x1b4   :  { %v989_v47 = vpack.c.bf16 %v547_v45, %v544_v44 }
 0x1b6   :  { %v1598_v48 = vpop.f32.mrb[16].mxu1  ;;  %1667 = vmatpush3.bf16.xpose.msra.mxu1 %v986_v20 }
 0x1b7   :  { %v559_v49 = vpop.f32.mrb[17].mxu1  ;;  %1668 = vmatprep.subr.bf16.mxu1 %v2097_v0  ;;  %v568_v51 = vadd.f32 %v1598_v48, %v2307_v1  ;;  %v1630_v40 = vpop.f32.mrb[4].mxu0 }
 0x1b8   :  { %v1599_v50 = vpop.f32.mrb[18].mxu1  ;;  %v560_v54 = vadd.f32 %v559_v49, %v2307_v1  ;;  %v861_v41 = vadd.f32 %v1630_v40, %v2377_v39  ;;  %v852_v42 = vpop.f32.mrb[5].mxu0 }
 0x1b9   :  { %v571_v52 = vadd.f32 %v1599_v50, %v2307_v1  ;;  %v562_v53 = vpop.f32.mrb[19].mxu1  ;;  %v1631_v43 = vpop.f32.mrb[6].mxu0 }
 0x1ba   :  { %v563_v55 = vadd.f32 %v562_v53, %v2307_v1  ;;  %v864_v44 = vadd.f32 %v1631_v43, %v2377_v39  ;;  %v855_v45 = vpop.f32.mrb[7].mxu0 }
 0x1bb   :  { %v992_v56 = vpack.c.bf16 %v571_v52, %v568_v51 }
 0x1bc   :  { %v991_v57 = vpack.c.bf16 %v563_v55, %v560_v54 }
 0x1be   :  { %1669 = vmatpush3.bf16.xpose.msra.mxu1 %v987_v37  ;;  %1681 = vmatpush3.bf16.xpose.msra.mxu0 %v991_v57  ;;  %v1602_v58 = vpop.f32.mrb[20].mxu1 }
 0x1bf   :  { %v584_v59 = vadd.f32 %v1602_v58, %v2307_v1  ;;  %v575_v60 = vpop.f32.mrb[21].mxu1  ;;  %1670 = vmatprep.subr.bf16.mxu1 %v2097_v0  ;;  %1682 = vmatprep.subr.bf16.mxu0 %v2097_v0  ;;  %v1634_v49 = vpop.f32.mrb[8].mxu0 }
 0x1c0   :  { %v576_v62 = vadd.f32 %v575_v60, %v2307_v1  ;;  %v1603_v2 = vpop.f32.mrb[22].mxu1  ;;  %v877_v50 = vadd.f32 %v1634_v49, %v2377_v39  ;;  %v868_v51 = vpop.f32.mrb[9].mxu0 }
 0x1c1   :  { %v587_v3 = vadd.f32 %v1603_v2, %v2307_v1  ;;  %v578_v4 = vpop.f32.mrb[23].mxu1  ;;  %v869_v52 = vadd.f32 %v868_v51, %v2377_v39  ;;  %v1635_v53 = vpop.f32.mrb[10].mxu0 }
 0x1c2   :  { %v579_v5 = vadd.f32 %v578_v4, %v2307_v1  ;;  %v880_v54 = vadd.f32 %v1635_v53, %v2377_v39  ;;  %v871_v55 = vpop.f32.mrb[11].mxu0 }
 0x1c3   :  { %v994_v6 = vpack.c.bf16 %v587_v3, %v584_v59 }
 0x1c4   :  { %v993_v7 = vpack.c.bf16 %v579_v5, %v576_v62  ;;  %v1109_v57 = vpack.c.bf16 %v880_v54, %v877_v50 }
 0x1c6   :  { %1671 = vmatpush3.bf16.xpose.msra.mxu1 %v988_v36  ;;  %1683 = vmatpush3.bf16.xpose.msra.mxu0 %v992_v56  ;;  %v1606_v8 = vpop.f32.mrb[24].mxu1  ;;  %v981_v36 = vpack.c.bf16 %v979_v35, %v979_v35  ;;  %v872_v56 = vadd.f32 %v871_v55, %v2377_v39 }
 0x1c7   :  { %1672 = vmatprep.subr.bf16.mxu1 %v2097_v0  ;;  %1684 = vmatprep.subr.bf16.mxu0 %v2097_v0  ;;  %v600_v9 = vadd.f32 %v1606_v8, %v2307_v1  ;;  %v591_v10 = vpop.f32.mrb[25].mxu1  ;;  %v1638_v59 = vpop.f32.mrb[12].mxu0 }
 0x1c8   :  { %v592_v11 = vadd.f32 %v591_v10, %v2307_v1  ;;  %v1607_v12 = vpop.f32.mrb[26].mxu1  ;;  %v1108_v58 = vpack.c.bf16 %v872_v56, %v869_v52  ;;  %v893_v60 = vadd.f32 %v1638_v59, %v2377_v39  ;;  %v884_v62 = vpop.f32.mrb[13].mxu0 }
 0x1c9   :  { %v603_v13 = vadd.f32 %v1607_v12, %v2307_v1  ;;  %v594_v15 = vpop.f32.mrb[27].mxu1  ;;  %v885_v2 = vadd.f32 %v884_v62, %v2377_v39  ;;  %v1639_v3 = vpop.f32.mrb[14].mxu0  ;;  %v1433_v62 = vld [vmem:[#allocation16] ss:$0 sm:$0xff] }
 0x1ca   :  { %v595_v16 = vadd.f32 %v594_v15, %v2307_v1  ;;  %v896_v4 = vadd.f32 %v1639_v3, %v2377_v39  ;;  %v887_v5 = vpop.f32.mrb[15].mxu0 }
 0x1cb   :  { %v996_v17 = vpack.c.bf16 %v603_v13, %v600_v9 }
 0x1cc   :  { %v995_v18 = vpack.c.bf16 %v595_v16, %v592_v11 }
 0x1ce   :  { %1673 = vmatpush3.bf16.xpose.msra.mxu1 %v989_v47  ;;  %1685 = vmatpush3.bf16.xpose.msra.mxu0 %v993_v7  ;;  %v1610_v20 = vpop.f32.mrb[28].mxu1  ;;  %v1107_v47 = vpack.c.bf16 %v864_v44, %v861_v41  ;;  %v1111_v7 = vpack.c.bf16 %v896_v4, %v893_v60 }
 0x1cf   :  { %1674 = vmatprep.subr.bf16.mxu1 %v2097_v0  ;;  %1686 = vmatprep.subr.bf16.mxu0 %v2097_v0  ;;  %v616_v21 = vadd.f32 %v1610_v20, %v2307_v1  ;;  %v607_v24 = vpop.f32.mrb[29].mxu1  ;;  %v1642_v9 = vpop.f32.mrb[16].mxu0 }
 0x1d0   :  { %v608_v25 = vadd.f32 %v607_v24, %v2307_v1  ;;  %v1611_v27 = vpop.f32.mrb[30].mxu1  ;;  %v909_v10 = vadd.f32 %v1642_v9, %v2377_v39  ;;  %v900_v11 = vpop.f32.mrb[17].mxu0 }
 0x1d1   :  { %v619_v29 = vadd.f32 %v1611_v27, %v2307_v1  ;;  %v610_v30 = vpop.f32.mrb[31].mxu1  ;;  %v901_v12 = vadd.f32 %v900_v11, %v2377_v39  ;;  %v1643_v13 = vpop.f32.mrb[18].mxu0 }
 0x1d2   :  { %v611_v31 = vadd.f32 %v610_v30, %v2307_v1  ;;  %v262_v1 = vadd.f32 %v2323_v32, %v175_v19  ;;  %v853_v32 = vadd.f32 %v852_v42, %v2377_v39  ;;  %v912_v14 = vadd.f32 %v1643_v13, %v2377_v39  ;;  %v903_v15 = vpop.f32.mrb[19].mxu0 }
 0x1d3   :  { %v998_v33 = vpack.c.bf16 %v619_v29, %v616_v21  ;;  %v904_v16 = vadd.f32 %v903_v15, %v2377_v39 }
 0x1d4   :  { %v997_v34 = vpack.c.bf16 %v611_v31, %v608_v25  ;;  %v980_v26 = vmul.f32 0.16903085, %v262_v1 }
 0x1d6   :  { %1675 = vmatpush3.bf16.xpose.msra.mxu1 %v990_v46  ;;  %1687 = vmatpush3.bf16.xpose.msra.mxu0 %v994_v6  ;;  %v982_v37 = vpack.c.bf16 %v980_v26, %v980_v26  ;;  %v856_v46 = vadd.f32 %v855_v45, %v2377_v39  ;;  %v888_v6 = vadd.f32 %v887_v5, %v2377_v39 }
 0x1d7   :  { %1688 = vmatprep.subr.bf16.mxu0 %v2097_v0  ;;  %1700 = vmatprep.subr.bf16.mxu1 %v2097_v0  ;;  %v1646_v19 = vpop.f32.mrb[20].mxu0 }
 0x1d8   :  { %v1106_v48 = vpack.c.bf16 %v856_v46, %v853_v32  ;;  %v1110_v8 = vpack.c.bf16 %v888_v6, %v885_v2  ;;  %v925_v20 = vadd.f32 %v1646_v19, %v2377_v39  ;;  %v916_v21 = vpop.f32.mrb[21].mxu0 }
 0x1d9   :  { %v917_v24 = vadd.f32 %v916_v21, %v2377_v39  ;;  %v1647_v25 = vpop.f32.mrb[22].mxu0 }
 0x1da   :  { %v928_v27 = vadd.f32 %v1647_v25, %v2377_v39  ;;  %v919_v28 = vpop.f32.mrb[23].mxu0 }
 0x1db   :  { %v920_v29 = vadd.f32 %v919_v28, %v2377_v39 }
 0x1dc   :  { %v1115_v30 = vpack.c.bf16 %v928_v27, %v925_v20 }
 0x1dd   :  { %1677 = vmatmul.mubr.bf16.vlgmr.msra.gmra.mrb[32].mxu1 %v981_v36  ;;  %v1114_v31 = vpack.c.bf16 %v920_v29, %v917_v24 }
 0x1de   :  { %1689 = vmatpush3.bf16.xpose.msra.mxu0 %v995_v18  ;;  %1716 = vmatprep.mubr.msk.bf16.mxu1 %vm2098_vm0, %v2097_v0  ;;  %v1112_v18 = vpack.c.bf16 %v904_v16, %v901_v12 }
 0x1df   :  { %1690 = vmatprep.subr.bf16.mxu0 %v2097_v0  ;;  %1701 = vmatpush3.bf16.msra.mxu1 %v1106_v48 }
 0x1e0   :  { %1702 = vmatprep.subr.bf16.mxu1 %v2097_v0 }
 0x1e3   :  { %1703 = vmatpush3.bf16.msra.mxu1 %v1107_v47 }
 0x1e4   :  { %1704 = vmatprep.subr.bf16.mxu1 %v2097_v0 }
 0x1e6   :  { %1691 = vmatpush3.bf16.xpose.msra.mxu0 %v996_v17  ;;  %v1113_v17 = vpack.c.bf16 %v912_v14, %v909_v10 }
 0x1e7   :  { %1692 = vmatprep.subr.bf16.mxu0 %v2097_v0  ;;  %1705 = vmatpush3.bf16.msra.mxu1 %v1108_v58 }
 0x1e8   :  { %1706 = vmatprep.subr.bf16.mxu1 %v2097_v0 }
 0x1eb   :  { %1707 = vmatpush3.bf16.msra.mxu1 %v1109_v57 }
 0x1ec   :  { %1708 = vmatprep.subr.bf16.mxu1 %v2097_v0 }
 0x1ee   :  { %1693 = vmatpush3.bf16.xpose.msra.mxu0 %v997_v34 }
 0x1ef   :  { %1694 = vmatprep.subr.bf16.mxu0 %v2097_v0  ;;  %1709 = vmatpush3.bf16.msra.mxu1 %v1110_v8 }
 0x1f0   :  { %1710 = vmatprep.subr.bf16.mxu1 %v2097_v0 }
 0x1f3   :  { %1711 = vmatpush3.bf16.msra.mxu1 %v1111_v7 }
 0x1f4   :  { %1712 = vmatprep.subr.bf16.mxu1 %v2097_v0 }
 0x1f6   :  { %1695 = vmatpush3.bf16.xpose.msra.mxu0 %v998_v33  ;;  %v1650_v33 = vpop.f32.mrb[24].mxu0 }
 0x1f7   :  { %1720 = vmatprep.subr.bf16.mxu0 %v2097_v0  ;;  %1713 = vmatpush3.bf16.msra.mxu1 %v1112_v18  ;;  %v941_v34 = vadd.f32 %v1650_v33, %v2377_v39  ;;  %v932_v35 = vpop.f32.mrb[25].mxu0  ;;  %v1834_v33 = vld [vmem:[#allocation13 + $0x10] sm:$0xff]  }
 0x1f8   :  { %1714 = vmatprep.subr.bf16.mxu1 %v2097_v0  ;;  %v933_v36 = vadd.f32 %v932_v35, %v2377_v39  ;;  %v1651_v1 = vpop.f32.mrb[26].mxu0  ;;  %v1836_v35 = vld [vmem:[#allocation13 + $0x20] sm:$0xff]  }
 0x1f9   :  { %v944_v26 = vadd.f32 %v1651_v1, %v2377_v39  ;;  %v1838_v1 = vld [vmem:[#allocation13 + $0x30] sm:$0xff]  }
 0x1fb   :  { %1715 = vmatpush3.bf16.msra.mxu1 %v1113_v17  ;;  %v1117_v40 = vpack.c.bf16 %v944_v26, %v941_v34  ;;  %v1835_v34 = vld [vmem:[#allocation13 + $0x18] sm:$0xff]  }
 0x1fc   :  { %1740 = vmatprep.subr.bf16.mxu1 %v2097_v0  ;;  %v1839_v26 = vld [vmem:[#allocation13 + $0x38] sm:$0xff]  }
 0x1fd   :  { %1697 = vmatmul.mubr.bf16.vlgmr.msra.gmra.mrb[36].mxu0 %v982_v37  ;;  %v935_v37 = vpop.f32.mrb[27].mxu0 }
 0x1fe   :  { %1736 = vmatprep.mubr.msk.bf16.mxu0 %vm2098_vm0, %v2097_v0  ;;  %1721 = vmatpush3.bf16.msra.mxu0 %v1114_v31  ;;  %v936_v38 = vadd.f32 %v935_v37, %v2377_v39  ;;  %v1654_v42 = vpop.f32.mrb[28].mxu0  ;;  %v1833_v31 = vld [vmem:[#allocation13 + $0x8] sm:$0xff]  }
 0x1ff   :  { %1722 = vmatprep.subr.bf16.mxu0 %v2097_v0  ;;  %v957_v32 = vadd.f32 %v1654_v42, %v2377_v39  ;;  %v948_v43 = vpop.f32.mrb[29].mxu0 }
 0x200   :  { %v1116_v41 = vpack.c.bf16 %v936_v38, %v933_v36  ;;  %v949_v44 = vadd.f32 %v948_v43, %v2377_v39  ;;  %v1655_v45 = vpop.f32.mrb[30].mxu0  ;;  %v1837_v36 = vld [vmem:[#allocation13 + $0x28] sm:$0xff]  }
 0x201   :  { %v960_v46 = vadd.f32 %v1655_v45, %v2377_v39  ;;  %v951_v47 = vpop.f32.mrb[31].mxu0 }
 0x202   :  { %1723 = vmatpush3.bf16.msra.mxu0 %v1115_v30  ;;  %v952_v48 = vadd.f32 %v951_v47, %v2377_v39  ;;  %v1658_v51 = vpop.f32.mrb[32].mxu0  ;;  %v1832_v30 = vld [vmem:[#allocation13] sm:$0xff]  }
 0x203   :  { %1724 = vmatprep.subr.bf16.mxu0 %v2097_v0  ;;  %v1119_v49 = vpack.c.bf16 %v960_v46, %v957_v32  ;;  %v973_v52 = vadd.f32 %v1658_v51, %v2377_v39  ;;  %v964_v53 = vpop.f32.mrb[33].mxu0  ;;  %v1221_v46 = vsub.s32 3, %v2301_v61 }
 0x204   :  { %v1118_v50 = vpack.c.bf16 %v952_v48, %v949_v44  ;;  %v965_v54 = vadd.f32 %v964_v53, %v2377_v39  ;;  %v1659_v55 = vpop.f32.mrb[34].mxu0 }
 0x205   :  { %v976_v56 = vadd.f32 %v1659_v55, %v2377_v39  ;;  %v967_v57 = vpop.f32.mrb[35].mxu0  ;;  %v1222_v47 = vrot.slane %v2304_v63, %v1221_v46 }
 0x206   :  { %1725 = vmatpush3.bf16.msra.mxu0 %v1116_v41  ;;  %v968_v58 = vadd.f32 %v967_v57, %v2377_v39 }
 0x207   :  { %1726 = vmatprep.subr.bf16.mxu0 %v2097_v0  ;;  %v1121_v59 = vpack.c.bf16 %v976_v56, %v973_v52 }
 0x208   :  { %v1120_v60 = vpack.c.bf16 %v968_v58, %v965_v54 }
 0x20a   :  { %1727 = vmatpush3.bf16.msra.mxu0 %v1117_v40 }
 0x20b   :  { %1728 = vmatprep.subr.bf16.mxu0 %v2097_v0 }
 0x20e   :  { %1729 = vmatpush3.bf16.msra.mxu0 %v1118_v50 }
 0x20f   :  { %1730 = vmatprep.subr.bf16.mxu0 %v2097_v0 }
 0x212   :  { %1731 = vmatpush3.bf16.msra.mxu0 %v1119_v49 }
 0x213   :  { %1732 = vmatprep.subr.bf16.mxu0 %v2097_v0 }
 0x216   :  { %1733 = vmatpush3.bf16.msra.mxu0 %v1120_v60 }
 0x217   :  { %1734 = vmatprep.subr.bf16.mxu0 %v2097_v0 }
 0x21a   :  { %1735 = vmatpush3.bf16.msra.mxu0 %v1121_v59 }
 0x2b0   :  { %v1040_v2 = vpop.f32.mrb[32].mxu1 }
 0x2b1   :  { %v1041_v3 = vadd.f32 %v1433_v62, %v1040_v2  ;;  %v1678_v4 = vpop.f32.mrb[33].mxu1 }
 0x2b2   :  { %v1043_v5 = vpop.f32.mrb[34].mxu1 }
 0x2b3   :  { %1086 = vmax.xlane.f32.xlu0 %v1041_v3  ;;  %v1679_v6 = vpop.f32.mrb[35].mxu1 }
 0x2d0   :  { %v1080_v7 = vpop.f32.mrb[36].mxu0 }
 0x2d1   :  { %v1081_v8 = vadd.f32 %v1433_v62, %v1080_v7  ;;  %v1698_v9 = vpop.f32.mrb[37].mxu0 }
 0x2d2   :  { %v1083_v39 = vpop.f32.mrb[38].mxu0 }
 0x2d3   :  { %1088 = vmax.xlane.f32.xlu0 %v1081_v8  ;;  %v1699_v10 = vpop.f32.mrb[39].mxu0 }
 0x2d4   :  { %v1344_v10 = vsub.s32 4, %v2301_v61 }
 0x340   :  { %v1087_v11 = vpop.xlane.xlu0 %1086 }
 0x341   :  { %v1090_v12 = vsub.f32 %v1041_v3, %v1087_v11  ;;  %v1350_v11 = vsub.s32 5, %v2301_v61 }
 0x343   :  { %v1092_v13 = vmul.f32 1.442695, %v1090_v12 }
 0x345   :  { %1840 = vpow2.f32 %v1092_v13  ;;  %v1345_v13 = vrot.slane %v2304_v63, %v1344_v10 }
 0x34f   :  { %v1841_v14 = vpop.eup %1840 }
 0x350   :  { %1096 = vadd.xlane.f32.xlu1 %v1841_v14 }
 0x360   :  { %v1089_v15 = vpop.xlane.xlu0 %1088 }
 0x361   :  { %v1091_v16 = vsub.f32 %v1081_v8, %v1089_v15 }
 0x363   :  { %v1094_v17 = vmul.f32 1.442695, %v1091_v16 }
 0x365   :  { %1842 = vpow2.f32 %v1094_v17  ;;  %v1351_v17 = vrot.slane %v2304_v63, %v1350_v11 }
 0x36f   :  { %v1843_v18 = vpop.eup %1842 }
 0x370   :  { %1098 = vadd.xlane.f32.xlu1 %v1843_v18 }
 0x3dd   :  { %v1097_v19 = vpop.xlane.xlu1 %1096 }
 0x3de   :  { %1844 = vrcp.f32 %v1097_v19 }
 0x3e8   :  { %v1845_v20 = vpop.eup %1844 }
 0x3e9   :  { %v1102_v21 = vmul.f32 %v1845_v20, %v1841_v14 }
 0x3eb   :  { %v1104_v24 = vpack.c.bf16 %v1102_v21, %v1102_v21 }
 0x3ed   :  { %1717 = vmatmul.mubr.bf16.vlgmr.msra.gmra.mrb[36].mxu1 %v1104_v24 }
 0x3ee   :  { %1756 = vmatprep.mubr.msk.bf16.mxu1 %vm2098_vm0, %v2097_v0  ;;  %1741 = vmatpush3.bf16.msra.mxu1 %v1832_v30 }
 0x3ef   :  { %1742 = vmatprep.subr.bf16.mxu1 %v2097_v0 }
 0x3f2   :  { %1743 = vmatpush3.bf16.msra.mxu1 %v1833_v31 }
 0x3f3   :  { %1744 = vmatprep.subr.bf16.mxu1 %v2097_v0 }
 0x3f6   :  { %1745 = vmatpush3.bf16.msra.mxu1 %v1834_v33 }
 0x3f7   :  { %1746 = vmatprep.subr.bf16.mxu1 %v2097_v0 }
 0x3fa   :  { %1747 = vmatpush3.bf16.msra.mxu1 %v1835_v34 }
 0x3fb   :  { %1748 = vmatprep.subr.bf16.mxu1 %v2097_v0 }
 0x3fd   :  { %v1099_v25 = vpop.xlane.xlu1 %1098 }
 0x3fe   :  { %1846 = vrcp.f32 %v1099_v25  ;;  %1749 = vmatpush3.bf16.msra.mxu1 %v1836_v35 }
 0x3ff   :  { %1750 = vmatprep.subr.bf16.mxu1 %v2097_v0 }
 0x402   :  { %1751 = vmatpush3.bf16.msra.mxu1 %v1837_v36 }
 0x403   :  { %1752 = vmatprep.subr.bf16.mxu1 %v2097_v0 }
 0x406   :  { %1753 = vmatpush3.bf16.msra.mxu1 %v1838_v1 }
 0x407   :  { %1754 = vmatprep.subr.bf16.mxu1 %v2097_v0 }
 0x408   :  { %v1847_v27 = vpop.eup %1846 }
 0x409   :  { %v1103_v28 = vmul.f32 %v1847_v27, %v1843_v18 }
 0x40a   :  { %1755 = vmatpush3.bf16.msra.mxu1 %v1839_v26 }
 0x40b   :  { %v1105_v29 = vpack.c.bf16 %v1103_v28, %v1103_v28 }
 0x40d   :  { %1737 = vmatmul.mubr.bf16.vlgmr.msra.gmra.mrb[40].mxu0 %v1105_v29 }
 0x4c0   :  { %v1156_v37 = vpop.f32.mrb[36].mxu1 }
 0x4c1   :  { %v1718_v38 = vpop.f32.mrb[37].mxu1 }
 0x4c2   :  { %v1159_v40 = vpop.f32.mrb[38].mxu1 }
 0x4c3   :  { %v1719_v41 = vpop.f32.mrb[39].mxu1 }
 0x4e0   :  { %v1196_v42 = vpop.f32.mrb[40].mxu0 }
 0x4e1   :  { %v1202_v32 = vpack.c.bf16 %v1196_v42, %v1156_v37  ;;  %v1738_v43 = vpop.f32.mrb[41].mxu0 }
 0x4e2   :  { %v1199_v44 = vpop.f32.mrb[42].mxu0 }
 0x4e3   :  { %v1739_v45 = vpop.f32.mrb[43].mxu0  ;;  %1757 = vmatmul.mubr.bf16.vlgmr.msra.gmra.mrb[40].mxu1 %v1202_v32 }
 0x5b6   :  { %v1305_v48 = vpop.f32.mrb[40].mxu1 }
 0x5b7   :  { %v1306_v49 = vadd.f32 %v1305_v48, %v1222_v47  ;;  %v1758_v50 = vpop.f32.mrb[41].mxu1 }
 0x5b8   :  { %v1308_v0 = vpop.f32.mrb[42].mxu1 }
 0x5b9   :  { %v1312_v51 = vadd.f32 %v1306_v49, %v2289_v22  ;;  %v1309_v52 = vadd.f32 %v1308_v0, %v1222_v47  ;;  %v1759_v53 = vpop.f32.mrb[43].mxu1 }
 0x5bb   :  { %v1313_v54 = vadd.f32 %v1309_v52, %v2291_v23  ;;  %1314 = vadd.xlane.f32.xlu0 %v1312_v51  ;;  %v1320_v55 = vmul.f32 %v1312_v51, %v1312_v51 }
 0x5bd   :  { %1316 = vadd.xlane.f32.xlu1 %v1313_v54  ;;  %v1321_v56 = vmul.f32 %v1313_v54, %v1313_v54 }
 0x5bf   :  { %1322 = vadd.xlane.f32.xlu0 %v1320_v55 }
 0x5c1   :  { %1324 = vadd.xlane.f32.xlu1 %v1321_v56 }
 0x648   :  { %v1315_v57 = vpop.xlane.xlu0 %1314 }
 0x649   :  { %v1318_v58 = vmul.f32 0.028571429, %v1315_v57 }
 0x64a   :  { %v1317_v59 = vpop.xlane.xlu1 %1316 }
 0x64b   :  { %v1319_v60 = vmul.f32 0.028571429, %v1317_v59  ;;  %v1328_v2 = vmul.f32 %v1318_v58, %v1318_v58  ;;  %v1334_v12 = vsub.f32 %v1312_v51, %v1318_v58 }
 0x64c   :  { %v1323_v62 = vpop.xlane.xlu0 %1322 }
 0x64d   :  { %v1326_v3 = vmul.f32 0.028571429, %v1323_v62  ;;  %v1329_v5 = vmul.f32 %v1319_v60, %v1319_v60  ;;  %v1335_v15 = vsub.f32 %v1313_v54, %v1319_v60 }
 0x64e   :  { %v1325_v4 = vpop.xlane.xlu1 %1324 }
 0x64f   :  { %v1330_v22 = vsub.f32 %v1326_v3, %v1328_v2  ;;  %v1327_v6 = vmul.f32 0.028571429, %v1325_v4 }
 0x651   :  { %v1332_v7 = vmax.f32 %v1330_v22, 0.0  ;;  %v1331_v8 = vsub.f32 %v1327_v6, %v1329_v5 }
 0x653   :  { %v1336_v23 = vadd.f32 1e-05, %v1332_v7  ;;  %v1333_v9 = vmax.f32 %v1331_v8, 0.0 }
 0x655   :  { %1848 = vrsqrt.f32 %v1336_v23  ;;  %v1337_v39 = vadd.f32 1e-05, %v1333_v9 }
 0x657   :  { %1850 = vrsqrt.f32 %v1337_v39 }
 0x65f   :  { %v1849_v14 = vpop.eup %1848 }
 0x660   :  { %v1340_v16 = vmul.f32 %v1849_v14, %v1334_v12 }
 0x661   :  { %v1851_v18 = vpop.eup %1850 }
 0x662   :  { %v1341_v19 = vmul.f32 %v1851_v18, %v1335_v15  ;;  %v1346_v20 = vmul.f32 %v1345_v13, %v1340_v16 }
 0x664   :  { %v1347_v21 = vmul.f32 %v1345_v13, %v1341_v19  ;;  %v1352_v24 = vadd.f32 %v1351_v17, %v1346_v20 }
 0x666   :  { %v1353_v25 = vadd.f32 %v1351_v17, %v1347_v21  ;;  %1354 = vst [vmem:[#allocation17] sm:$0xff] %v1352_v24 }
 0x668   :  { %1355 = vst [vmem:[#allocation17 + $0x8] sm:$0xff] %v1353_v25 }
 0x669   :  { %2061 = shalt.err (!%p2058_p6)
}
 0x66a   :  { %s2062_s10 = scalar_lea.hbm %s2467_s9, 256 }
 0x66b   :  { %p2063_p7 = scmp.ne.s32.totalorder %s2467_s9, %s2062_s10  ;;  %p2066_p8 = scmp.lt.u32.totalorder %s2062_s10, %s2467_s9 }
 0x66d   :  { %p2068_p9 = pnand %p2066_p8, %p2063_p7 }
 0x66f   :  { %2071 = shalt.err (!%p2068_p9)
}
 0x670   :  { %1367 = dma.vmem_to_hbm [thread:$0]  %s1362_s20, 256, %s2467_s9, [#allocation4], %s2091_s7, %s2091_s7, %s2092_s27  }
 0x671   :  { %2082 = dma.done.wait [#allocation4], 256  }
 0x672   :  { %2083 = vsyncadd [#allocation4], 4294967040 }
 0x673   :  { %1371 = vsyncpa [#allocation3], 1 }
 0x674   :  { %1372 = vsyncpa [#allocation6], 1 }
 0x675   :  { %1373 = vsyncpa [#allocation9], 1 }
 0x676   :  { %1374 = vsyncpa [#allocation12], 1 }
 0x677   :  { %1375 = vsyncpa [#allocation15], 1 }
 0x678   :  { %1376 = vsyncpa [#allocation4], 1 }

</bundles_post_ra>
